<compile_context>
chip_gen: v7x
topology: tpu7x:2x2x1
jax: 0.10.0
libtpu: 0.0.40
codegen_flags: <defaults>
</compile_context>

<pallas_src>
import functools

import numpy as np
import jax
import jax.numpy as jnp
from jax import lax
from jax.experimental import pallas as pl
from jax.experimental.pallas import tpu as pltpu

LN_EPS = 1e-6                 # LayerNorm2d eps in the PyTorch module
MAX_SPATIAL_TILE = 8192       # lane-axis tile cap (multiple of 128)


def _default_vmem_limit():
    """Scoped-VMEM limit derived from the actual chip (v5e/v6e: 128 MiB phys,
    v7x: 64 MiB phys); conservative fallback if the query is unavailable."""
    try:
        info = pltpu.get_tpu_info()
        cap = int(getattr(info, "vmem_capacity_bytes", 0) or 0)
        if cap > 0:
            return int(min(cap * 6 // 10, 96 * 1024 * 1024))
    except Exception:
        pass
    return 32 * 1024 * 1024


VMEM_LIMIT = _default_vmem_limit()


def _compiler_params(semantics):
    return pltpu.CompilerParams(dimension_semantics=semantics,
                                vmem_limit_bytes=VMEM_LIMIT)


# ----------------------------------------------------------------------------- sizing helpers
def _pick_spatial_tile(L, c_rows, itemsize):
    """Lane-axis tile for the spatially tiled kernels.

    `c_rows` ~ number of channel rows live per column (IO + f32 temporaries are
    folded into the per-column byte estimate).  Prefers exact divisors of L;
    otherwise returns a 128-multiple tile and the caller's cdiv grid handles
    the ragged tail with masked edge blocks (no full-extent VMEM blowup)."""
    per_col = max(1, c_rows) * (4 * itemsize + 48)
    cap = max(128, VMEM_LIMIT // per_col)
    max_tile = min(MAX_SPATIAL_TILE, (cap // 128) * 128)
    if L <= max_tile:
        return L
    best = 0
    t = 128
    while t <= max_tile:
        if L % t == 0:
            best = t
        t += 128
    return best if best else max_tile


def _pick_channel_tile(c, L, itemsize):
    """Channel tile for the split-path dwconv: either the full half (always a
    layout-legal block) or a multiple-of-8 divisor that fits the budget."""
    budget = VMEM_LIMIT // 2
    per_ch = L * (6 * itemsize + 40)
    if c * per_ch <= budget or c % 8 != 0:
        # TODO(synk): c not a multiple of 8 with a plane too big for VMEM would
        # need padded channel tiles; unrealistic for NAFNet widths (16/32/64+).
        return c
    tc = 8
    for t in range(8, c + 1, 8):
        if c % t == 0 and t * per_ch <= budget:
            tc = t
    return tc


def _front_fused_fits(c_rows, L, itemsize):
    """Can the fully fused front kernel hold one (c, H*W) plane (in + gate out,
    double buffered, plus ~8 f32 plane-sized temporaries) in VMEM?"""
    need = c_rows * L * (4 * itemsize + 36)
    return need <= VMEM_LIMIT


def _colrow(H, W):
    """(2, H*W) int32: row 0 = column index, row 1 = row index of each flat
    position.  Passed as a tiny kernel input so no integer div/mod is needed
    in-kernel to build the 3x3 boundary masks."""
    col = np.tile(np.arange(W, dtype=np.int32), H)
    row = np.repeat(np.arange(H, dtype=np.int32), W)
    return jnp.asarray(np.stack([col, row], axis=0))


# ----------------------------------------------------------------------------- dwconv helpers
def _make_tap_masks(col, row, H, W):
    """Validity masks (shape (1, L) bool) for the 8 non-center 3x3 taps,
    built once per kernel invocation (hoisted out of the tap loop)."""
    col_ok = {-1: col >= 1, 1: col <= W - 2}
    row_ok = {-1: row >= 1, 1: row <= H - 2}
    masks = {}
    for dh in (-1, 0, 1):
        for dw in (-1, 0, 1):
            if dh == 0 and dw == 0:
                continue
            parts = []
            if dh != 0:
                parts.append(row_ok[dh])
            if dw != 0:
                parts.append(col_ok[dw])
            m = parts[0]
            for p in parts[1:]:
                m = m & p
            masks[(dh, dw)] = m
    return masks


def _dwconv3x3_flat(u, w9, b, masks, W):
    """Depthwise 3x3 conv (zero padded) on a lane-dense (C, H*W) plane.
    u: (C, L) f32;  w9: (C, 9) f32 row-major 3x3 taps;  b: (C, 1) f32.
    Each tap is a lane roll by -(dh*W + dw) masked at the image boundaries."""
    L = u.shape[1]
    acc = w9[:, 4:5] * u                              # center tap: no shift/mask
    for (dh, dw), mask in masks.items():
        off = dh * W + dw                             # flat source offset
        shifted = pltpu.roll(u, shift=(-off) % L, axis=1)
        k = (dh + 1) * 3 + (dw + 1)
        acc = acc + w9[:, k:k + 1] * jnp.where(mask, shifted, 0.0)
    return acc + b


# ----------------------------------------------------------------------------- KA: LN1 + conv1 + dwconv + gate + pool
def _front_fused_kernel(x_ref, cr_ref, lnw_ref, lnb_ref,
                        w1a_ref, w1b_ref, b1a_ref, b1b_ref,
                        w2a_ref, w2b_ref, b2a_ref, b2b_ref,
                        gate_ref, pool_ref, *, H, W, eps):
    f32 = jnp.float32
    x = x_ref[0].astype(f32)                          # (c, L) channels on sublanes
    mu = jnp.mean(x, axis=0, keepdims=True)
    xc = x - mu
    var = jnp.mean(xc * xc, axis=0, keepdims=True)
    xn = xc * lax.rsqrt(var + eps)
    xn = xn * lnw_ref[...].astype(f32) + lnb_ref[...].astype(f32)
    # conv1 (1x1), split into the two SimpleGate halves (avoids sublane slices).
    u1 = jnp.dot(w1a_ref[...].astype(f32), xn,
                 preferred_element_type=f32) + b1a_ref[...].astype(f32)
    u2 = jnp.dot(w1b_ref[...].astype(f32), xn,
                 preferred_element_type=f32) + b1b_ref[...].astype(f32)
    # depthwise 3x3 on the lane-dense flattened plane.
    masks = _make_tap_masks(cr_ref[0:1, :], cr_ref[1:2, :], H, W)
    d1 = _dwconv3x3_flat(u1, w2a_ref[...].astype(f32),
                         b2a_ref[...].astype(f32), masks, W)
    d2 = _dwconv3x3_flat(u2, w2b_ref[...].astype(f32),
                         b2b_ref[...].astype(f32), masks, W)
    gate = d1 * d2                                    # SimpleGate
    gate_ref[0] = gate.astype(gate_ref.dtype)
    # fused SCA global average pool (full plane is resident -> exact mean).
    pool_ref[0] = jnp.mean(gate, axis=1, keepdims=True).astype(pool_ref.dtype)


def _front_fused(x3, lnw, lnb, w1a, w1b, b1a, b1b, w2a, w2b, b2a, b2b,
                 colrow, H, W):
    B, c, L = x3.shape
    ch = w1a.shape[0]                                 # dw_channel // 2
    itemsize = jnp.dtype(x3.dtype).itemsize
    cost = pl.CostEstimate(
        flops=int(B * L * (4 * c * ch + 44 * ch)),
        transcendentals=int(B * L),
        bytes_accessed=int(2 * B * max(c, ch) * L * itemsize),
    )
    full = lambda b: (0, 0)
    return pl.pallas_call(
        functools.partial(_front_fused_kernel, H=H, W=W, eps=LN_EPS),
        out_shape=(jax.ShapeDtypeStruct((B, ch, L), x3.dtype),
                   jax.ShapeDtypeStruct((B, ch, 1), jnp.float32)),
        grid_spec=pltpu.PrefetchScalarGridSpec(
            num_scalar_prefetch=0,
            grid=(B,),
            in_specs=[
                pl.BlockSpec((1, c, L), lambda b: (b, 0, 0)),   # x
                pl.BlockSpec((2, L), full),                     # col/row indices
                pl.BlockSpec((c, 1), full),                     # ln1 weight
                pl.BlockSpec((c, 1), full),                     # ln1 bias
                pl.BlockSpec((ch, c), full),                    # w1 first half
                pl.BlockSpec((ch, c), full),                    # w1 second half
                pl.BlockSpec((ch, 1), full),                    # b1 first half
                pl.BlockSpec((ch, 1), full),                    # b1 second half
                pl.BlockSpec((ch, 9), full),                    # w2 first half
                pl.BlockSpec((ch, 9), full),                    # w2 second half
                pl.BlockSpec((ch, 1), full),                    # b2 first half
                pl.BlockSpec((ch, 1), full),                    # b2 second half
            ],
            out_specs=(pl.BlockSpec((1, ch, L), lambda b: (b, 0, 0)),
                       pl.BlockSpec((1, ch, 1), lambda b: (b, 0, 0))),
        ),
        compiler_params=_compiler_params(("parallel",)),
        cost_estimate=cost,
    )(x3, colrow, lnw, lnb, w1a, w1b, b1a, b1b, w2a, w2b, b2a, b2b)


# ----------------------------------------------------------------------------- KB: SCA * x + conv3 + beta residual
def _sca_conv_res_kernel(g_ref, s_ref, w_ref, b_ref, beta_ref, inp_ref, o_ref):
    f32 = jnp.float32
    g = g_ref[0].astype(f32)                          # (c, TL)
    s = s_ref[0].astype(f32)                          # (c, 1) SCA gain, kept f32
    t = jnp.dot(w_ref[...].astype(f32), g * s, preferred_element_type=f32)
    t = t + b_ref[...].astype(f32)
    o_ref[0] = (inp_ref[0].astype(f32)
                + t * beta_ref[...].astype(f32)).astype(o_ref.dtype)


def _sca_conv_residual(gate, scale, w3, b3, beta, x3, tl):
    B, cg, L = gate.shape
    cout = w3.shape[0]
    itemsize = jnp.dtype(gate.dtype).itemsize
    nt = pl.cdiv(L, tl)
    cost = pl.CostEstimate(
        flops=int(2 * B * L * cg * cout + 4 * B * cg * L),
        transcendentals=0,
        bytes_accessed=int((2 * B * cg * L + B * cout * L) * itemsize),
    )
    full = lambda b, t: (0, 0)
    return pl.pallas_call(
        _sca_conv_res_kernel,
        out_shape=jax.ShapeDtypeStruct((B, cout, L), x3.dtype),
        grid_spec=pltpu.PrefetchScalarGridSpec(
            num_scalar_prefetch=0,
            grid=(B, nt),
            in_specs=[
                pl.BlockSpec((1, cg, tl), lambda b, t: (b, 0, t)),
                pl.BlockSpec((1, cg, 1), lambda b, t: (b, 0, 0)),
                pl.BlockSpec((cout, cg), full),
                pl.BlockSpec((cout, 1), full),
                pl.BlockSpec((cout, 1), full),
                pl.BlockSpec((1, cout, tl), lambda b, t: (b, 0, t)),
            ],
            out_specs=pl.BlockSpec((1, cout, tl), lambda b, t: (b, 0, t)),
        ),
        compiler_params=_compiler_params(("parallel", "parallel")),
        cost_estimate=cost,
    )(gate, scale, w3, b3, beta, x3)


# ----------------------------------------------------------------------------- KC: LN2 + conv4 + gate + conv5 + gamma residual
def _ffn_fused_kernel(y_ref, lnw_ref, lnb_ref, w4a_ref, w4b_ref, b4a_ref, b4b_ref,
                      w5_ref, b5_ref, gamma_ref, o_ref, *, eps):
    f32 = jnp.float32
    y = y_ref[0].astype(f32)                          # (c, TL)
    mu = jnp.mean(y, axis=0, keepdims=True)
    yc = y - mu
    var = jnp.mean(yc * yc, axis=0, keepdims=True)
    yn = yc * lax.rsqrt(var + eps)
    yn = yn * lnw_ref[...].astype(f32) + lnb_ref[...].astype(f32)
    u1 = jnp.dot(w4a_ref[...].astype(f32), yn,
                 preferred_element_type=f32) + b4a_ref[...].astype(f32)
    u2 = jnp.dot(w4b_ref[...].astype(f32), yn,
                 preferred_element_type=f32) + b4b_ref[...].astype(f32)
    g = u1 * u2                                       # SimpleGate
    t = jnp.dot(w5_ref[...].astype(f32), g,
                preferred_element_type=f32) + b5_ref[...].astype(f32)
    o_ref[0] = (y + t * gamma_ref[...].astype(f32)).astype(o_ref.dtype)


def _ffn_fused(y, lnw, lnb, w4a, w4b, b4a, b4b, w5, b5, gamma, tl):
    B, c, L = y.shape
    ch = w4a.shape[0]                                 # ffn_channel // 2
    itemsize = jnp.dtype(y.dtype).itemsize
    nt = pl.cdiv(L, tl)
    cost = pl.CostEstimate(
        flops=int(B * L * (6 * c * ch + 16 * c)),
        transcendentals=int(B * L),
        bytes_accessed=int(2 * B * c * L * itemsize),
    )
    full = lambda b, t: (0, 0)
    return pl.pallas_call(
        functools.partial(_ffn_fused_kernel, eps=LN_EPS),
        out_shape=jax.ShapeDtypeStruct((B, c, L), y.dtype),
        grid_spec=pltpu.PrefetchScalarGridSpec(
            num_scalar_prefetch=0,
            grid=(B, nt),
            in_specs=[
                pl.BlockSpec((1, c, tl), lambda b, t: (b, 0, t)),
                pl.BlockSpec((c, 1), full),
                pl.BlockSpec((c, 1), full),
                pl.BlockSpec((ch, c), full),
                pl.BlockSpec((ch, c), full),
                pl.BlockSpec((ch, 1), full),
                pl.BlockSpec((ch, 1), full),
                pl.BlockSpec((c, ch), full),
                pl.BlockSpec((c, 1), full),
                pl.BlockSpec((c, 1), full),
            ],
            out_specs=pl.BlockSpec((1, c, tl), lambda b, t: (b, 0, t)),
        ),
        compiler_params=_compiler_params(("parallel", "parallel")),
        cost_estimate=cost,
    )(y, lnw, lnb, w4a, w4b, b4a, b4b, w5, b5, gamma)


# ----------------------------------------------------------------------------- split-front fallback (large planes)
def _norm_conv1x1_kernel(x_ref, lnw_ref, lnb_ref, w_ref, b_ref, o_ref, *, eps):
    f32 = jnp.float32
    x = x_ref[0].astype(f32)
    mu = jnp.mean(x, axis=0, keepdims=True)
    xc = x - mu
    var = jnp.mean(xc * xc, axis=0, keepdims=True)
    xn = xc * lax.rsqrt(var + eps)
    xn = xn * lnw_ref[...].astype(f32) + lnb_ref[...].astype(f32)
    y = jnp.dot(w_ref[...].astype(f32), xn,
                preferred_element_type=f32) + b_ref[...].astype(f32)
    o_ref[0] = y.astype(o_ref.dtype)


def _norm_conv1x1(x3, lnw, lnb, w, b, tl):
    B, cin, L = x3.shape
    cout = w.shape[0]
    itemsize = jnp.dtype(x3.dtype).itemsize
    nt = pl.cdiv(L, tl)
    cost = pl.CostEstimate(
        flops=int(2 * B * L * cin * cout + 10 * B * cin * L),
        transcendentals=int(B * L),
        bytes_accessed=int((B * cin * L + B * cout * L) * itemsize),
    )
    full = lambda b_, t: (0, 0)
    return pl.pallas_call(
        functools.partial(_norm_conv1x1_kernel, eps=LN_EPS),
        out_shape=jax.ShapeDtypeStruct((B, cout, L), x3.dtype),
        grid_spec=pltpu.PrefetchScalarGridSpec(
            num_scalar_prefetch=0,
            grid=(B, nt),
            in_specs=[
                pl.BlockSpec((1, cin, tl), lambda b_, t: (b_, 0, t)),
                pl.BlockSpec((cin, 1), full),
                pl.BlockSpec((cin, 1), full),
                pl.BlockSpec((cout, cin), full),
                pl.BlockSpec((cout, 1), full),
            ],
            out_specs=pl.BlockSpec((1, cout, tl), lambda b_, t: (b_, 0, t)),
        ),
        compiler_params=_compiler_params(("parallel", "parallel")),
        cost_estimate=cost,
    )(x3, lnw, lnb, w, b)


def _dwconv_gate_pool_kernel(u1_ref, u2_ref, cr_ref, w1_ref, w2_ref,
                             b1_ref, b2_ref, gate_ref, pool_ref, *, H, W):
    f32 = jnp.float32
    masks = _make_tap_masks(cr_ref[0:1, :], cr_ref[1:2, :], H, W)
    d1 = _dwconv3x3_flat(u1_ref[0, 0].astype(f32), w1_ref[...].astype(f32),
                         b1_ref[...].astype(f32), masks, W)
    d2 = _dwconv3x3_flat(u2_ref[0, 0].astype(f32), w2_ref[...].astype(f32),
                         b2_ref[...].astype(f32), masks, W)
    gate = d1 * d2
    gate_ref[0] = gate.astype(gate_ref.dtype)
    pool_ref[0] = jnp.mean(gate, axis=1, keepdims=True).astype(pool_ref.dtype)


def _dwconv_gate_pool(u, w2a, w2b, b2a, b2b, colrow, H, W):
    B, c2, L = u.shape
    c = c2 // 2
    itemsize = jnp.dtype(u.dtype).itemsize
    tc = _pick_channel_tile(c, L, itemsize)
    nt = c // tc
    u4 = u.reshape(B, 2, c, L)                        # half axis -> leading block dim
    cost = pl.CostEstimate(
        flops=int(20 * B * c2 * L),
        transcendentals=0,
        bytes_accessed=int((B * c2 * L + B * c * L) * itemsize),
    )
    full = lambda b, ci: (0, 0)
    return pl.pallas_call(
        functools.partial(_dwconv_gate_pool_kernel, H=H, W=W),
        out_shape=(jax.ShapeDtypeStruct((B, c, L), u.dtype),
                   jax.ShapeDtypeStruct((B, c, 1), jnp.float32)),
        grid_spec=pltpu.PrefetchScalarGridSpec(
            num_scalar_prefetch=0,
            grid=(B, nt),
            in_specs=[
                pl.BlockSpec((1, 1, tc, L), lambda b, ci: (b, 0, ci, 0)),
                pl.BlockSpec((1, 1, tc, L), lambda b, ci: (b, 1, ci, 0)),
                pl.BlockSpec((2, L), full),
                pl.BlockSpec((tc, 9), lambda b, ci: (ci, 0)),
                pl.BlockSpec((tc, 9), lambda b, ci: (ci, 0)),
                pl.BlockSpec((tc, 1), lambda b, ci: (ci, 0)),
                pl.BlockSpec((tc, 1), lambda b, ci: (ci, 0)),
            ],
            out_specs=(pl.BlockSpec((1, tc, L), lambda b, ci: (b, ci, 0)),
                       pl.BlockSpec((1, tc, 1), lambda b, ci: (b, ci, 0))),
        ),
        compiler_params=_compiler_params(("parallel", "parallel")),
        cost_estimate=cost,
    )(u4, u4, colrow, w2a, w2b, b2a, b2b)


# ----------------------------------------------------------------------------- full block
@functools.partial(jax.jit, static_argnames=("force_split",))
def nafblock_forward(inp, params, force_split=False):
    """NAFBlock forward (dropout = identity since drop_out_rate == 0)."""
    B, C, H, W = inp.shape
    L = H * W
    itemsize = jnp.dtype(inp.dtype).itemsize
    x3 = inp.reshape(B, C, L)                         # free view, no transpose
    colrow = _colrow(H, W)

    # Split conv1 / conv2 / conv4 params into their SimpleGate halves (tiny).
    dw = params["w1"].shape[0]
    hd = dw // 2
    w1a, w1b = params["w1"][:hd], params["w1"][hd:]
    b1a, b1b = params["b1"][:hd], params["b1"][hd:]
    w2f = params["w2"].reshape(dw, 9)
    b2f = params["b2"].reshape(dw, 1)
    w2a, w2b = w2f[:hd], w2f[hd:]
    b2a, b2b = b2f[:hd], b2f[hd:]
    ffn = params["w4"].shape[0]
    hf = ffn // 2
    w4a, w4b = params["w4"][:hf], params["w4"][hf:]
    b4a, b4b = params["b4"][:hf], params["b4"][hf:]

    if force_split or not _front_fused_fits(max(C, hd), L, itemsize):
        # Large plane: LN1 + conv1 spatially tiled, then lane-dense
        # dwconv + SimpleGate + pool tiled over channel halves.
        tl1 = _pick_spatial_tile(L, C + dw, itemsize)
        u = _norm_conv1x1(x3, params["ln1_w"], params["ln1_b"],
                          params["w1"], params["b1"], tl1)          # (B, 2c, L)
        gate, pooled = _dwconv_gate_pool(u, w2a, w2b, b2a, b2b, colrow, H, W)
    else:
        gate, pooled = _front_fused(x3, params["ln1_w"], params["ln1_b"],
                                    w1a, w1b, b1a, b1b, w2a, w2b, b2a, b2b,
                                    colrow, H, W)                   # (B, c, L), (B, c, 1)

    # SCA: 1x1 conv on the pooled (B, c) vector; tiny, stays in plain JAX f32.
    scale = jnp.dot(pooled[..., 0], params["w_sca"].T.astype(jnp.float32),
                    precision=lax.Precision.HIGHEST)
    scale = (scale + params["b_sca"].astype(jnp.float32))[..., None]  # (B, c, 1) f32

    tl = _pick_spatial_tile(L, max(C, hd, hf), itemsize)
    # gate * sca -> conv3 -> * beta -> + inp   (fused)
    y = _sca_conv_residual(gate, scale, params["w3"], params["b3"],
                           params["beta"], x3, tl)                  # (B, c, L)
    # norm2 -> conv4 -> SimpleGate -> conv5 -> * gamma -> + y   (fused)
    out = _ffn_fused(y, params["ln2_w"], params["ln2_b"],
                     w4a, w4b, b4a, b4b, params["w5"], params["b5"],
                     params["gamma"], tl)                           # (B, c, L)
    return out.reshape(B, C, H, W)


# ----------------------------------------------------------------------------- pure-JAX reference
def _reference_nafblock(x, p, eps=LN_EPS):
    P = lax.Precision.HIGHEST

    def ln2d(x, w, b):
        mu = jnp.mean(x, axis=1, keepdims=True)
        var = jnp.mean((x - mu) ** 2, axis=1, keepdims=True)
        y = (x - mu) / jnp.sqrt(var + eps)
        return w.reshape(1, -1, 1, 1) * y + b.reshape(1, -1, 1, 1)

    def conv1x1(x, w, b):
        return jnp.einsum("oi,bihw->bohw", w, x, precision=P) + b.reshape(1, -1, 1, 1)

    def dwconv3x3(x, w, b):
        C = x.shape[1]
        y = lax.conv_general_dilated(
            x, w.reshape(C, 1, 3, 3), window_strides=(1, 1),
            padding=((1, 1), (1, 1)),
            dimension_numbers=("NCHW", "OIHW", "NCHW"),
            feature_group_count=C, precision=P)
        return y + b.reshape(1, -1, 1, 1)

    def simple_gate(x):
        c2 = x.shape[1] // 2
        return x[:, :c2] * x[:, c2:]

    xn = ln2d(x, p["ln1_w"], p["ln1_b"])
    u = conv1x1(xn, p["w1"], p["b1"])
    u = dwconv3x3(u, p["w2"], p["b2"])
    g = simple_gate(u)
    pooled = jnp.mean(g, axis=(2, 3), keepdims=True)
    g = g * conv1x1(pooled, p["w_sca"], p["b_sca"])
    t = conv1x1(g, p["w3"], p["b3"])
    y = x + t * p["beta"].reshape(1, -1, 1, 1)
    xn2 = ln2d(y, p["ln2_w"], p["ln2_b"])
    u2 = conv1x1(xn2, p["w4"], p["b4"])
    g2 = simple_gate(u2)
    t2 = conv1x1(g2, p["w5"], p["b5"])
    return y + t2 * p["gamma"].reshape(1, -1, 1, 1)


def _make_params(key, c):
    dw_ch = 2 * c      # DW_Expand = 2
    ffn_ch = 2 * c     # FFN_Expand = 2
    keys = jax.random.split(key, 18)

    def rnd(i, shape, scale):
        return scale * jax.random.normal(keys[i], shape, dtype=jnp.float32)

    # LayerNorm weights/bias and beta/gamma are randomized (module defaults of
    # ones/zeros would make the residual paths trivially disappear).
    return {
        "ln1_w": 1.0 + rnd(0, (c, 1), 0.1),
        "ln1_b": rnd(1, (c, 1), 0.1),
        "ln2_w": 1.0 + rnd(2, (c, 1), 0.1),
        "ln2_b": rnd(3, (c, 1), 0.1),
        "w1": rnd(4, (dw_ch, c), c ** -0.5),         # conv1: c -> 2c (1x1)
        "b1": rnd(5, (dw_ch, 1), 0.1),
        "w2": rnd(6, (dw_ch, 3, 3), 1.0 / 3.0),      # conv2: depthwise 3x3
        "b2": rnd(7, (dw_ch, 1, 1), 0.1),
        "w_sca": rnd(8, (c, c), c ** -0.5),          # sca 1x1 conv: c -> c
        "b_sca": rnd(9, (c,), 0.1),
        "w3": rnd(10, (c, c), c ** -0.5),            # conv3: c -> c (1x1)
        "b3": rnd(11, (c, 1), 0.1),
        "w4": rnd(12, (ffn_ch, c), c ** -0.5),       # conv4: c -> 2c (1x1)
        "b4": rnd(13, (ffn_ch, 1), 0.1),
        "w5": rnd(14, (c, ffn_ch // 2), c ** -0.5),  # conv5: c -> c (1x1)
        "b5": rnd(15, (c, 1), 0.1),
        "beta": rnd(16, (c, 1), 0.5),
        "gamma": rnd(17, (c, 1), 0.5),
    }


# ----------------------------------------------------------------------------- main
if __name__ == "__main__":
    failures = []

    def check(name, x, params, force_split=False):
        out = jax.block_until_ready(
            nafblock_forward(x, params, force_split=force_split))
        ref = jax.block_until_ready(_reference_nafblock(x, params))
        ok = (out.shape == ref.shape
              and bool(jnp.allclose(out, ref, atol=1e-2, rtol=1e-2)))
        if not ok:
            err = float(jnp.max(jnp.abs(out - ref)))
            failures.append(f"{name}: max_abs_err={err:.3e}")

    key = jax.random.PRNGKey(0)
    k1, k2, k3, k4 = jax.random.split(key, 4)

    # Primary config: fully fused front path.
    p1 = _make_params(k1, 4)
    x1 = jax.random.normal(k2, (2, 4, 16, 16), dtype=jnp.float32)
    check("fused_16x16", x1, p1)

    # Asymmetric H != W config, exercised through BOTH the fused path and the
    # forced split (large-image fallback) path to pin the roll/shift direction.
    p2 = _make_params(k3, 8)
    x2 = jax.random.normal(k4, (2, 8, 8, 32), dtype=jnp.float32)
    check("fused_8x32", x2, p2)
    check("split_8x32", x2, p2, force_split=True)

    if not failures:
        print("KERNEL_OK")
    else:
        print("KERNEL_MISMATCH " + "; ".join(failures))
</pallas_src>

<mosaic_0001>
module attributes {stable_mosaic.version = 11 : i64} {
  func.func @_front_fused_kernel(%arg0: i32, %arg1: memref<1x4x256xf32, #tpu.memory_space<vmem>>, %arg2: memref<2x256xi32, #tpu.memory_space<vmem>>, %arg3: memref<4x1xf32, #tpu.memory_space<vmem>>, %arg4: memref<4x1xf32, #tpu.memory_space<vmem>>, %arg5: memref<4x4xf32, #tpu.memory_space<vmem>>, %arg6: memref<4x4xf32, #tpu.memory_space<vmem>>, %arg7: memref<4x1xf32, #tpu.memory_space<vmem>>, %arg8: memref<4x1xf32, #tpu.memory_space<vmem>>, %arg9: memref<4x9xf32, #tpu.memory_space<vmem>>, %arg10: memref<4x9xf32, #tpu.memory_space<vmem>>, %arg11: memref<4x1xf32, #tpu.memory_space<vmem>>, %arg12: memref<4x1xf32, #tpu.memory_space<vmem>>, %arg13: memref<1x4x256xf32, #tpu.memory_space<vmem>>, %arg14: memref<1x4x1xf32, #tpu.memory_space<vmem>>) attributes {dimension_semantics = [#tpu.dimension_semantics<parallel>], iteration_bounds = array<i64: 2>, scalar_prefetch = 0 : i64, scratch_operands = 0 : i64, tpu.core_type = #tpu.core_type<tc>, window_params = [{transform_indices = @transform_0, window_bounds = array<i64: 1, 4, 256>}, {pipeline_mode = #tpu.pipeline_mode<synchronous>, transform_indices = @transform_1, window_bounds = array<i64: 2, 256>}, {pipeline_mode = #tpu.pipeline_mode<synchronous>, transform_indices = @transform_2, window_bounds = array<i64: 4, 1>}, {pipeline_mode = #tpu.pipeline_mode<synchronous>, transform_indices = @transform_3, window_bounds = array<i64: 4, 1>}, {pipeline_mode = #tpu.pipeline_mode<synchronous>, transform_indices = @transform_4, window_bounds = array<i64: 4, 4>}, {pipeline_mode = #tpu.pipeline_mode<synchronous>, transform_indices = @transform_5, window_bounds = array<i64: 4, 4>}, {pipeline_mode = #tpu.pipeline_mode<synchronous>, transform_indices = @transform_6, window_bounds = array<i64: 4, 1>}, {pipeline_mode = #tpu.pipeline_mode<synchronous>, transform_indices = @transform_7, window_bounds = array<i64: 4, 1>}, {pipeline_mode = #tpu.pipeline_mode<synchronous>, transform_indices = @transform_8, window_bounds = array<i64: 4, 9>}, {pipeline_mode = #tpu.pipeline_mode<synchronous>, transform_indices = @transform_9, window_bounds = array<i64: 4, 9>}, {pipeline_mode = #tpu.pipeline_mode<synchronous>, transform_indices = @transform_10, window_bounds = array<i64: 4, 1>}, {pipeline_mode = #tpu.pipeline_mode<synchronous>, transform_indices = @transform_11, window_bounds = array<i64: 4, 1>}, {transform_indices = @transform_12, window_bounds = array<i64: 1, 4, 256>}, {transform_indices = @transform_13, window_bounds = array<i64: 1, 4, 1>}]} {
    %c0 = arith.constant 0 : index
    %c0_0 = arith.constant 0 : index
    %c0_1 = arith.constant 0 : index
    %0 = vector.load %arg1[%c0, %c0_0, %c0_1] : memref<1x4x256xf32, #tpu.memory_space<vmem>>, vector<1x4x256xf32>
    %1 = vector.shape_cast %0 : vector<1x4x256xf32> to vector<4x256xf32>
    %cst = arith.constant dense<0.000000e+00> : vector<256xf32>
    %2 = vector.multi_reduction <add>, %1, %cst [0] : vector<4x256xf32> to vector<256xf32>
    %3 = vector.shape_cast %2 : vector<256xf32> to vector<1x256xf32>
    %cst_2 = arith.constant 4.000000e+00 : f32
    %4 = vector.broadcast %cst_2 : f32 to vector<1x256xf32>
    %5 = arith.divf %3, %4 : vector<1x256xf32>
    %6 = vector.broadcast %5 : vector<1x256xf32> to vector<4x256xf32>
    %7 = arith.subf %1, %6 : vector<4x256xf32>
    %8 = arith.mulf %7, %7 : vector<4x256xf32>
    %cst_3 = arith.constant dense<0.000000e+00> : vector<256xf32>
    %9 = vector.multi_reduction <add>, %8, %cst_3 [0] : vector<4x256xf32> to vector<256xf32>
    %10 = vector.shape_cast %9 : vector<256xf32> to vector<1x256xf32>
    %cst_4 = arith.constant 4.000000e+00 : f32
    %11 = vector.broadcast %cst_4 : f32 to vector<1x256xf32>
    %12 = arith.divf %10, %11 : vector<1x256xf32>
    %cst_5 = arith.constant 9.99999997E-7 : f32
    %13 = vector.broadcast %cst_5 : f32 to vector<1x256xf32>
    %14 = arith.addf %12, %13 : vector<1x256xf32>
    %15 = math.rsqrt %14 : vector<1x256xf32>
    %16 = vector.broadcast %15 : vector<1x256xf32> to vector<4x256xf32>
    %17 = arith.mulf %7, %16 : vector<4x256xf32>
    %c0_6 = arith.constant 0 : index
    %c0_7 = arith.constant 0 : index
    %18 = vector.load %arg3[%c0_6, %c0_7] : memref<4x1xf32, #tpu.memory_space<vmem>>, vector<4x1xf32>
    %19 = vector.broadcast %18 : vector<4x1xf32> to vector<4x256xf32>
    %20 = arith.mulf %17, %19 : vector<4x256xf32>
    %c0_8 = arith.constant 0 : index
    %c0_9 = arith.constant 0 : index
    %21 = vector.load %arg4[%c0_8, %c0_9] : memref<4x1xf32, #tpu.memory_space<vmem>>, vector<4x1xf32>
    %22 = vector.broadcast %21 : vector<4x1xf32> to vector<4x256xf32>
    %23 = arith.addf %20, %22 : vector<4x256xf32>
    %c0_10 = arith.constant 0 : index
    %c0_11 = arith.constant 0 : index
    %24 = vector.load %arg5[%c0_10, %c0_11] : memref<4x4xf32, #tpu.memory_space<vmem>>, vector<4x4xf32>
    %cst_12 = arith.constant dense<0.000000e+00> : vector<4x256xf32>
    %25 = tpu.matmul %24, %23, %cst_12 {dimension_numbers = #tpu.dot_dimension_numbers<[1], [0], [0], [1], [0, 0, 1, 1], [], []>} : vector<4x4xf32>, vector<4x256xf32>, vector<4x256xf32> -> vector<4x256xf32>
    %c0_13 = arith.constant 0 : index
    %c0_14 = arith.constant 0 : index
    %26 = vector.load %arg7[%c0_13, %c0_14] : memref<4x1xf32, #tpu.memory_space<vmem>>, vector<4x1xf32>
    %27 = vector.broadcast %26 : vector<4x1xf32> to vector<4x256xf32>
    %28 = arith.addf %25, %27 : vector<4x256xf32>
    %c0_15 = arith.constant 0 : index
    %c0_16 = arith.constant 0 : index
    %29 = vector.load %arg6[%c0_15, %c0_16] : memref<4x4xf32, #tpu.memory_space<vmem>>, vector<4x4xf32>
    %cst_17 = arith.constant dense<0.000000e+00> : vector<4x256xf32>
    %30 = tpu.matmul %29, %23, %cst_17 {dimension_numbers = #tpu.dot_dimension_numbers<[1], [0], [0], [1], [0, 0, 1, 1], [], []>} : vector<4x4xf32>, vector<4x256xf32>, vector<4x256xf32> -> vector<4x256xf32>
    %c0_18 = arith.constant 0 : index
    %c0_19 = arith.constant 0 : index
    %31 = vector.load %arg8[%c0_18, %c0_19] : memref<4x1xf32, #tpu.memory_space<vmem>>, vector<4x1xf32>
    %32 = vector.broadcast %31 : vector<4x1xf32> to vector<4x256xf32>
    %33 = arith.addf %30, %32 : vector<4x256xf32>
    %c0_20 = arith.constant 0 : index
    %c0_21 = arith.constant 0 : index
    %34 = vector.load %arg2[%c0_20, %c0_21] : memref<2x256xi32, #tpu.memory_space<vmem>>, vector<1x256xi32>
    %c1 = arith.constant 1 : index
    %c0_22 = arith.constant 0 : index
    %35 = vector.load %arg2[%c1, %c0_22] : memref<2x256xi32, #tpu.memory_space<vmem>>, vector<1x256xi32>
    %c1_i32 = arith.constant 1 : i32
    %36 = vector.broadcast %c1_i32 : i32 to vector<1x256xi32>
    %37 = arith.cmpi sge, %34, %36 : vector<1x256xi32>
    %c14_i32 = arith.constant 14 : i32
    %38 = vector.broadcast %c14_i32 : i32 to vector<1x256xi32>
    %39 = arith.cmpi sle, %34, %38 : vector<1x256xi32>
    %c1_i32_23 = arith.constant 1 : i32
    %40 = vector.broadcast %c1_i32_23 : i32 to vector<1x256xi32>
    %41 = arith.cmpi sge, %35, %40 : vector<1x256xi32>
    %c14_i32_24 = arith.constant 14 : i32
    %42 = vector.broadcast %c14_i32_24 : i32 to vector<1x256xi32>
    %43 = arith.cmpi sle, %35, %42 : vector<1x256xi32>
    %44 = arith.andi %41, %37 : vector<1x256xi1>
    %45 = arith.andi %41, %39 : vector<1x256xi1>
    %46 = arith.andi %43, %37 : vector<1x256xi1>
    %47 = arith.andi %43, %39 : vector<1x256xi1>
    %c0_25 = arith.constant 0 : index
    %c0_26 = arith.constant 0 : index
    %48 = vector.load %arg9[%c0_25, %c0_26] : memref<4x9xf32, #tpu.memory_space<vmem>>, vector<4x9xf32>
    %c0_27 = arith.constant 0 : index
    %c0_28 = arith.constant 0 : index
    %49 = vector.load %arg11[%c0_27, %c0_28] : memref<4x1xf32, #tpu.memory_space<vmem>>, vector<4x1xf32>
    %50 = vector.extract_strided_slice %48 {offsets = [0, 4], sizes = [4, 1], strides = [1, 1]} : vector<4x9xf32> to vector<4x1xf32>
    %51 = vector.broadcast %50 : vector<4x1xf32> to vector<4x256xf32>
    %52 = arith.mulf %51, %28 : vector<4x256xf32>
    %c17_i32 = arith.constant 17 : i32
    %53 = tpu.dynamic_rotate %28 by %c17_i32 dim 1 : vector<4x256xf32>, i32 -> vector<4x256xf32>
    %54 = vector.extract_strided_slice %48 {offsets = [0, 0], sizes = [4, 1], strides = [1, 1]} : vector<4x9xf32> to vector<4x1xf32>
    %cst_29 = arith.constant 0.000000e+00 : f32
    %55 = vector.shape_cast %44 : vector<1x256xi1> to vector<1x256xi1>
    %56 = vector.broadcast %55 : vector<1x256xi1> to vector<4x256xi1>
    %57 = vector.broadcast %cst_29 : f32 to vector<4x256xf32>
    %58 = arith.select %56, %53, %57 : vector<4x256xi1>, vector<4x256xf32>
    %59 = vector.broadcast %54 : vector<4x1xf32> to vector<4x256xf32>
    %60 = arith.mulf %59, %58 : vector<4x256xf32>
    %61 = arith.addf %52, %60 : vector<4x256xf32>
    %c16_i32 = arith.constant 16 : i32
    %62 = tpu.dynamic_rotate %28 by %c16_i32 dim 1 : vector<4x256xf32>, i32 -> vector<4x256xf32>
    %63 = vector.extract_strided_slice %48 {offsets = [0, 1], sizes = [4, 1], strides = [1, 1]} : vector<4x9xf32> to vector<4x1xf32>
    %cst_30 = arith.constant 0.000000e+00 : f32
    %64 = vector.shape_cast %41 : vector<1x256xi1> to vector<1x256xi1>
    %65 = vector.broadcast %64 : vector<1x256xi1> to vector<4x256xi1>
    %66 = vector.broadcast %cst_30 : f32 to vector<4x256xf32>
    %67 = arith.select %65, %62, %66 : vector<4x256xi1>, vector<4x256xf32>
    %68 = vector.broadcast %63 : vector<4x1xf32> to vector<4x256xf32>
    %69 = arith.mulf %68, %67 : vector<4x256xf32>
    %70 = arith.addf %61, %69 : vector<4x256xf32>
    %c15_i32 = arith.constant 15 : i32
    %71 = tpu.dynamic_rotate %28 by %c15_i32 dim 1 : vector<4x256xf32>, i32 -> vector<4x256xf32>
    %72 = vector.extract_strided_slice %48 {offsets = [0, 2], sizes = [4, 1], strides = [1, 1]} : vector<4x9xf32> to vector<4x1xf32>
    %cst_31 = arith.constant 0.000000e+00 : f32
    %73 = vector.shape_cast %45 : vector<1x256xi1> to vector<1x256xi1>
    %74 = vector.broadcast %73 : vector<1x256xi1> to vector<4x256xi1>
    %75 = vector.broadcast %cst_31 : f32 to vector<4x256xf32>
    %76 = arith.select %74, %71, %75 : vector<4x256xi1>, vector<4x256xf32>
    %77 = vector.broadcast %72 : vector<4x1xf32> to vector<4x256xf32>
    %78 = arith.mulf %77, %76 : vector<4x256xf32>
    %79 = arith.addf %70, %78 : vector<4x256xf32>
    %c1_i32_32 = arith.constant 1 : i32
    %80 = tpu.dynamic_rotate %28 by %c1_i32_32 dim 1 : vector<4x256xf32>, i32 -> vector<4x256xf32>
    %81 = vector.extract_strided_slice %48 {offsets = [0, 3], sizes = [4, 1], strides = [1, 1]} : vector<4x9xf32> to vector<4x1xf32>
    %cst_33 = arith.constant 0.000000e+00 : f32
    %82 = vector.shape_cast %37 : vector<1x256xi1> to vector<1x256xi1>
    %83 = vector.broadcast %82 : vector<1x256xi1> to vector<4x256xi1>
    %84 = vector.broadcast %cst_33 : f32 to vector<4x256xf32>
    %85 = arith.select %83, %80, %84 : vector<4x256xi1>, vector<4x256xf32>
    %86 = vector.broadcast %81 : vector<4x1xf32> to vector<4x256xf32>
    %87 = arith.mulf %86, %85 : vector<4x256xf32>
    %88 = arith.addf %79, %87 : vector<4x256xf32>
    %c255_i32 = arith.constant 255 : i32
    %89 = tpu.dynamic_rotate %28 by %c255_i32 dim 1 : vector<4x256xf32>, i32 -> vector<4x256xf32>
    %90 = vector.extract_strided_slice %48 {offsets = [0, 5], sizes = [4, 1], strides = [1, 1]} : vector<4x9xf32> to vector<4x1xf32>
    %cst_34 = arith.constant 0.000000e+00 : f32
    %91 = vector.shape_cast %39 : vector<1x256xi1> to vector<1x256xi1>
    %92 = vector.broadcast %91 : vector<1x256xi1> to vector<4x256xi1>
    %93 = vector.broadcast %cst_34 : f32 to vector<4x256xf32>
    %94 = arith.select %92, %89, %93 : vector<4x256xi1>, vector<4x256xf32>
    %95 = vector.broadcast %90 : vector<4x1xf32> to vector<4x256xf32>
    %96 = arith.mulf %95, %94 : vector<4x256xf32>
    %97 = arith.addf %88, %96 : vector<4x256xf32>
    %c241_i32 = arith.constant 241 : i32
    %98 = tpu.dynamic_rotate %28 by %c241_i32 dim 1 : vector<4x256xf32>, i32 -> vector<4x256xf32>
    %99 = vector.extract_strided_slice %48 {offsets = [0, 6], sizes = [4, 1], strides = [1, 1]} : vector<4x9xf32> to vector<4x1xf32>
    %cst_35 = arith.constant 0.000000e+00 : f32
    %100 = vector.shape_cast %46 : vector<1x256xi1> to vector<1x256xi1>
    %101 = vector.broadcast %100 : vector<1x256xi1> to vector<4x256xi1>
    %102 = vector.broadcast %cst_35 : f32 to vector<4x256xf32>
    %103 = arith.select %101, %98, %102 : vector<4x256xi1>, vector<4x256xf32>
    %104 = vector.broadcast %99 : vector<4x1xf32> to vector<4x256xf32>
    %105 = arith.mulf %104, %103 : vector<4x256xf32>
    %106 = arith.addf %97, %105 : vector<4x256xf32>
    %c240_i32 = arith.constant 240 : i32
    %107 = tpu.dynamic_rotate %28 by %c240_i32 dim 1 : vector<4x256xf32>, i32 -> vector<4x256xf32>
    %108 = vector.extract_strided_slice %48 {offsets = [0, 7], sizes = [4, 1], strides = [1, 1]} : vector<4x9xf32> to vector<4x1xf32>
    %cst_36 = arith.constant 0.000000e+00 : f32
    %109 = vector.shape_cast %43 : vector<1x256xi1> to vector<1x256xi1>
    %110 = vector.broadcast %109 : vector<1x256xi1> to vector<4x256xi1>
    %111 = vector.broadcast %cst_36 : f32 to vector<4x256xf32>
    %112 = arith.select %110, %107, %111 : vector<4x256xi1>, vector<4x256xf32>
    %113 = vector.broadcast %108 : vector<4x1xf32> to vector<4x256xf32>
    %114 = arith.mulf %113, %112 : vector<4x256xf32>
    %115 = arith.addf %106, %114 : vector<4x256xf32>
    %c239_i32 = arith.constant 239 : i32
    %116 = tpu.dynamic_rotate %28 by %c239_i32 dim 1 : vector<4x256xf32>, i32 -> vector<4x256xf32>
    %117 = vector.extract_strided_slice %48 {offsets = [0, 8], sizes = [4, 1], strides = [1, 1]} : vector<4x9xf32> to vector<4x1xf32>
    %cst_37 = arith.constant 0.000000e+00 : f32
    %118 = vector.shape_cast %47 : vector<1x256xi1> to vector<1x256xi1>
    %119 = vector.broadcast %118 : vector<1x256xi1> to vector<4x256xi1>
    %120 = vector.broadcast %cst_37 : f32 to vector<4x256xf32>
    %121 = arith.select %119, %116, %120 : vector<4x256xi1>, vector<4x256xf32>
    %122 = vector.broadcast %117 : vector<4x1xf32> to vector<4x256xf32>
    %123 = arith.mulf %122, %121 : vector<4x256xf32>
    %124 = arith.addf %115, %123 : vector<4x256xf32>
    %125 = vector.broadcast %49 : vector<4x1xf32> to vector<4x256xf32>
    %126 = arith.addf %124, %125 : vector<4x256xf32>
    %c0_38 = arith.constant 0 : index
    %c0_39 = arith.constant 0 : index
    %127 = vector.load %arg10[%c0_38, %c0_39] : memref<4x9xf32, #tpu.memory_space<vmem>>, vector<4x9xf32>
    %c0_40 = arith.constant 0 : index
    %c0_41 = arith.constant 0 : index
    %128 = vector.load %arg12[%c0_40, %c0_41] : memref<4x1xf32, #tpu.memory_space<vmem>>, vector<4x1xf32>
    %129 = vector.extract_strided_slice %127 {offsets = [0, 4], sizes = [4, 1], strides = [1, 1]} : vector<4x9xf32> to vector<4x1xf32>
    %130 = vector.broadcast %129 : vector<4x1xf32> to vector<4x256xf32>
    %131 = arith.mulf %130, %33 : vector<4x256xf32>
    %c17_i32_42 = arith.constant 17 : i32
    %132 = tpu.dynamic_rotate %33 by %c17_i32_42 dim 1 : vector<4x256xf32>, i32 -> vector<4x256xf32>
    %133 = vector.extract_strided_slice %127 {offsets = [0, 0], sizes = [4, 1], strides = [1, 1]} : vector<4x9xf32> to vector<4x1xf32>
    %cst_43 = arith.constant 0.000000e+00 : f32
    %134 = vector.shape_cast %44 : vector<1x256xi1> to vector<1x256xi1>
    %135 = vector.broadcast %134 : vector<1x256xi1> to vector<4x256xi1>
    %136 = vector.broadcast %cst_43 : f32 to vector<4x256xf32>
    %137 = arith.select %135, %132, %136 : vector<4x256xi1>, vector<4x256xf32>
    %138 = vector.broadcast %133 : vector<4x1xf32> to vector<4x256xf32>
    %139 = arith.mulf %138, %137 : vector<4x256xf32>
    %140 = arith.addf %131, %139 : vector<4x256xf32>
    %c16_i32_44 = arith.constant 16 : i32
    %141 = tpu.dynamic_rotate %33 by %c16_i32_44 dim 1 : vector<4x256xf32>, i32 -> vector<4x256xf32>
    %142 = vector.extract_strided_slice %127 {offsets = [0, 1], sizes = [4, 1], strides = [1, 1]} : vector<4x9xf32> to vector<4x1xf32>
    %cst_45 = arith.constant 0.000000e+00 : f32
    %143 = vector.shape_cast %41 : vector<1x256xi1> to vector<1x256xi1>
    %144 = vector.broadcast %143 : vector<1x256xi1> to vector<4x256xi1>
    %145 = vector.broadcast %cst_45 : f32 to vector<4x256xf32>
    %146 = arith.select %144, %141, %145 : vector<4x256xi1>, vector<4x256xf32>
    %147 = vector.broadcast %142 : vector<4x1xf32> to vector<4x256xf32>
    %148 = arith.mulf %147, %146 : vector<4x256xf32>
    %149 = arith.addf %140, %148 : vector<4x256xf32>
    %c15_i32_46 = arith.constant 15 : i32
    %150 = tpu.dynamic_rotate %33 by %c15_i32_46 dim 1 : vector<4x256xf32>, i32 -> vector<4x256xf32>
    %151 = vector.extract_strided_slice %127 {offsets = [0, 2], sizes = [4, 1], strides = [1, 1]} : vector<4x9xf32> to vector<4x1xf32>
    %cst_47 = arith.constant 0.000000e+00 : f32
    %152 = vector.shape_cast %45 : vector<1x256xi1> to vector<1x256xi1>
    %153 = vector.broadcast %152 : vector<1x256xi1> to vector<4x256xi1>
    %154 = vector.broadcast %cst_47 : f32 to vector<4x256xf32>
    %155 = arith.select %153, %150, %154 : vector<4x256xi1>, vector<4x256xf32>
    %156 = vector.broadcast %151 : vector<4x1xf32> to vector<4x256xf32>
    %157 = arith.mulf %156, %155 : vector<4x256xf32>
    %158 = arith.addf %149, %157 : vector<4x256xf32>
    %c1_i32_48 = arith.constant 1 : i32
    %159 = tpu.dynamic_rotate %33 by %c1_i32_48 dim 1 : vector<4x256xf32>, i32 -> vector<4x256xf32>
    %160 = vector.extract_strided_slice %127 {offsets = [0, 3], sizes = [4, 1], strides = [1, 1]} : vector<4x9xf32> to vector<4x1xf32>
    %cst_49 = arith.constant 0.000000e+00 : f32
    %161 = vector.shape_cast %37 : vector<1x256xi1> to vector<1x256xi1>
    %162 = vector.broadcast %161 : vector<1x256xi1> to vector<4x256xi1>
    %163 = vector.broadcast %cst_49 : f32 to vector<4x256xf32>
    %164 = arith.select %162, %159, %163 : vector<4x256xi1>, vector<4x256xf32>
    %165 = vector.broadcast %160 : vector<4x1xf32> to vector<4x256xf32>
    %166 = arith.mulf %165, %164 : vector<4x256xf32>
    %167 = arith.addf %158, %166 : vector<4x256xf32>
    %c255_i32_50 = arith.constant 255 : i32
    %168 = tpu.dynamic_rotate %33 by %c255_i32_50 dim 1 : vector<4x256xf32>, i32 -> vector<4x256xf32>
    %169 = vector.extract_strided_slice %127 {offsets = [0, 5], sizes = [4, 1], strides = [1, 1]} : vector<4x9xf32> to vector<4x1xf32>
    %cst_51 = arith.constant 0.000000e+00 : f32
    %170 = vector.shape_cast %39 : vector<1x256xi1> to vector<1x256xi1>
    %171 = vector.broadcast %170 : vector<1x256xi1> to vector<4x256xi1>
    %172 = vector.broadcast %cst_51 : f32 to vector<4x256xf32>
    %173 = arith.select %171, %168, %172 : vector<4x256xi1>, vector<4x256xf32>
    %174 = vector.broadcast %169 : vector<4x1xf32> to vector<4x256xf32>
    %175 = arith.mulf %174, %173 : vector<4x256xf32>
    %176 = arith.addf %167, %175 : vector<4x256xf32>
    %c241_i32_52 = arith.constant 241 : i32
    %177 = tpu.dynamic_rotate %33 by %c241_i32_52 dim 1 : vector<4x256xf32>, i32 -> vector<4x256xf32>
    %178 = vector.extract_strided_slice %127 {offsets = [0, 6], sizes = [4, 1], strides = [1, 1]} : vector<4x9xf32> to vector<4x1xf32>
    %cst_53 = arith.constant 0.000000e+00 : f32
    %179 = vector.shape_cast %46 : vector<1x256xi1> to vector<1x256xi1>
    %180 = vector.broadcast %179 : vector<1x256xi1> to vector<4x256xi1>
    %181 = vector.broadcast %cst_53 : f32 to vector<4x256xf32>
    %182 = arith.select %180, %177, %181 : vector<4x256xi1>, vector<4x256xf32>
    %183 = vector.broadcast %178 : vector<4x1xf32> to vector<4x256xf32>
    %184 = arith.mulf %183, %182 : vector<4x256xf32>
    %185 = arith.addf %176, %184 : vector<4x256xf32>
    %c240_i32_54 = arith.constant 240 : i32
    %186 = tpu.dynamic_rotate %33 by %c240_i32_54 dim 1 : vector<4x256xf32>, i32 -> vector<4x256xf32>
    %187 = vector.extract_strided_slice %127 {offsets = [0, 7], sizes = [4, 1], strides = [1, 1]} : vector<4x9xf32> to vector<4x1xf32>
    %cst_55 = arith.constant 0.000000e+00 : f32
    %188 = vector.shape_cast %43 : vector<1x256xi1> to vector<1x256xi1>
    %189 = vector.broadcast %188 : vector<1x256xi1> to vector<4x256xi1>
    %190 = vector.broadcast %cst_55 : f32 to vector<4x256xf32>
    %191 = arith.select %189, %186, %190 : vector<4x256xi1>, vector<4x256xf32>
    %192 = vector.broadcast %187 : vector<4x1xf32> to vector<4x256xf32>
    %193 = arith.mulf %192, %191 : vector<4x256xf32>
    %194 = arith.addf %185, %193 : vector<4x256xf32>
    %c239_i32_56 = arith.constant 239 : i32
    %195 = tpu.dynamic_rotate %33 by %c239_i32_56 dim 1 : vector<4x256xf32>, i32 -> vector<4x256xf32>
    %196 = vector.extract_strided_slice %127 {offsets = [0, 8], sizes = [4, 1], strides = [1, 1]} : vector<4x9xf32> to vector<4x1xf32>
    %cst_57 = arith.constant 0.000000e+00 : f32
    %197 = vector.shape_cast %47 : vector<1x256xi1> to vector<1x256xi1>
    %198 = vector.broadcast %197 : vector<1x256xi1> to vector<4x256xi1>
    %199 = vector.broadcast %cst_57 : f32 to vector<4x256xf32>
    %200 = arith.select %198, %195, %199 : vector<4x256xi1>, vector<4x256xf32>
    %201 = vector.broadcast %196 : vector<4x1xf32> to vector<4x256xf32>
    %202 = arith.mulf %201, %200 : vector<4x256xf32>
    %203 = arith.addf %194, %202 : vector<4x256xf32>
    %204 = vector.broadcast %128 : vector<4x1xf32> to vector<4x256xf32>
    %205 = arith.addf %203, %204 : vector<4x256xf32>
    %206 = arith.mulf %126, %205 : vector<4x256xf32>
    %c0_58 = arith.constant 0 : index
    %c0_59 = arith.constant 0 : index
    %c0_60 = arith.constant 0 : index
    %207 = vector.load %arg13[%c0_58, %c0_59, %c0_60] : memref<1x4x256xf32, #tpu.memory_space<vmem>>, vector<1x4x256xf32>
    %208 = vector.shape_cast %207 : vector<1x4x256xf32> to vector<4x256xf32>
    %209 = vector.shape_cast %206 : vector<4x256xf32> to vector<1x4x256xf32>
    tpu.vector_store %arg13[%c0_58, %c0_59, %c0_60], %209 {strides = array<i32>} : memref<1x4x256xf32, #tpu.memory_space<vmem>>, vector<1x4x256xf32>,
    %cst_61 = arith.constant dense<0.000000e+00> : vector<4xf32>
    %210 = vector.multi_reduction <add>, %206, %cst_61 [1] : vector<4x256xf32> to vector<4xf32>
    %211 = vector.shape_cast %210 : vector<4xf32> to vector<4x1xf32>
    %cst_62 = arith.constant 2.560000e+02 : f32
    %212 = vector.broadcast %cst_62 : f32 to vector<4x1xf32>
    %213 = arith.divf %211, %212 : vector<4x1xf32>
    %c0_63 = arith.constant 0 : index
    %c0_64 = arith.constant 0 : index
    %c0_65 = arith.constant 0 : index
    %214 = vector.load %arg14[%c0_63, %c0_64, %c0_65] : memref<1x4x1xf32, #tpu.memory_space<vmem>>, vector<1x4x1xf32>
    %215 = vector.shape_cast %214 : vector<1x4x1xf32> to vector<4x1xf32>
    %216 = vector.shape_cast %213 : vector<4x1xf32> to vector<1x4x1xf32>
    tpu.vector_store %arg14[%c0_63, %c0_64, %c0_65], %216 {strides = array<i32>} : memref<1x4x1xf32, #tpu.memory_space<vmem>>, vector<1x4x1xf32>,
    return
  }
  func.func @transform_0(%arg0: i32) -> (i32, i32, i32) {
    %c0_i32 = arith.constant 0 : i32
    %c0_i32_0 = arith.constant 0 : i32
    %c0_i32_1 = arith.constant 0 : i32
    return %arg0, %c0_i32, %c0_i32_0 : i32, i32, i32
  }
  func.func @transform_1(%arg0: i32) -> (i32, i32) {
    %c0_i32 = arith.constant 0 : i32
    %c0_i32_0 = arith.constant 0 : i32
    %c0_i32_1 = arith.constant 0 : i32
    return %c0_i32, %c0_i32_0 : i32, i32
  }
  func.func @transform_2(%arg0: i32) -> (i32, i32) {
    %c0_i32 = arith.constant 0 : i32
    %c0_i32_0 = arith.constant 0 : i32
    %c0_i32_1 = arith.constant 0 : i32
    return %c0_i32, %c0_i32_0 : i32, i32
  }
  func.func @transform_3(%arg0: i32) -> (i32, i32) {
    %c0_i32 = arith.constant 0 : i32
    %c0_i32_0 = arith.constant 0 : i32
    %c0_i32_1 = arith.constant 0 : i32
    return %c0_i32, %c0_i32_0 : i32, i32
  }
  func.func @transform_4(%arg0: i32) -> (i32, i32) {
    %c0_i32 = arith.constant 0 : i32
    %c0_i32_0 = arith.constant 0 : i32
    %c0_i32_1 = arith.constant 0 : i32
    return %c0_i32, %c0_i32_0 : i32, i32
  }
  func.func @transform_5(%arg0: i32) -> (i32, i32) {
    %c0_i32 = arith.constant 0 : i32
    %c0_i32_0 = arith.constant 0 : i32
    %c0_i32_1 = arith.constant 0 : i32
    return %c0_i32, %c0_i32_0 : i32, i32
  }
  func.func @transform_6(%arg0: i32) -> (i32, i32) {
    %c0_i32 = arith.constant 0 : i32
    %c0_i32_0 = arith.constant 0 : i32
    %c0_i32_1 = arith.constant 0 : i32
    return %c0_i32, %c0_i32_0 : i32, i32
  }
  func.func @transform_7(%arg0: i32) -> (i32, i32) {
    %c0_i32 = arith.constant 0 : i32
    %c0_i32_0 = arith.constant 0 : i32
    %c0_i32_1 = arith.constant 0 : i32
    return %c0_i32, %c0_i32_0 : i32, i32
  }
  func.func @transform_8(%arg0: i32) -> (i32, i32) {
    %c0_i32 = arith.constant 0 : i32
    %c0_i32_0 = arith.constant 0 : i32
    %c0_i32_1 = arith.constant 0 : i32
    return %c0_i32, %c0_i32_0 : i32, i32
  }
  func.func @transform_9(%arg0: i32) -> (i32, i32) {
    %c0_i32 = arith.constant 0 : i32
    %c0_i32_0 = arith.constant 0 : i32
    %c0_i32_1 = arith.constant 0 : i32
    return %c0_i32, %c0_i32_0 : i32, i32
  }
  func.func @transform_10(%arg0: i32) -> (i32, i32) {
    %c0_i32 = arith.constant 0 : i32
    %c0_i32_0 = arith.constant 0 : i32
    %c0_i32_1 = arith.constant 0 : i32
    return %c0_i32, %c0_i32_0 : i32, i32
  }
  func.func @transform_11(%arg0: i32) -> (i32, i32) {
    %c0_i32 = arith.constant 0 : i32
    %c0_i32_0 = arith.constant 0 : i32
    %c0_i32_1 = arith.constant 0 : i32
    return %c0_i32, %c0_i32_0 : i32, i32
  }
  func.func @transform_12(%arg0: i32) -> (i32, i32, i32) {
    %c0_i32 = arith.constant 0 : i32
    %c0_i32_0 = arith.constant 0 : i32
    %c0_i32_1 = arith.constant 0 : i32
    return %arg0, %c0_i32, %c0_i32_0 : i32, i32, i32
  }
  func.func @transform_13(%arg0: i32) -> (i32, i32, i32) {
    %c0_i32 = arith.constant 0 : i32
    %c0_i32_0 = arith.constant 0 : i32
    %c0_i32_1 = arith.constant 0 : i32
    return %arg0, %c0_i32, %c0_i32_0 : i32, i32, i32
  }
}

module attributes {stable_mosaic.version = 11 : i64} {
  func.func @_sca_conv_res_kernel(%arg0: i32, %arg1: i32, %arg2: memref<1x4x256xf32, #tpu.memory_space<vmem>>, %arg3: memref<1x4x1xf32, #tpu.memory_space<vmem>>, %arg4: memref<4x4xf32, #tpu.memory_space<vmem>>, %arg5: memref<4x1xf32, #tpu.memory_space<vmem>>, %arg6: memref<4x1xf32, #tpu.memory_space<vmem>>, %arg7: memref<1x4x256xf32, #tpu.memory_space<vmem>>, %arg8: memref<1x4x256xf32, #tpu.memory_space<vmem>>) attributes {dimension_semantics = [#tpu.dimension_semantics<parallel>, #tpu.dimension_semantics<parallel>], iteration_bounds = array<i64: 2, 1>, scalar_prefetch = 0 : i64, scratch_operands = 0 : i64, tpu.core_type = #tpu.core_type<tc>, window_params = [{transform_indices = @transform_0, window_bounds = array<i64: 1, 4, 256>}, {transform_indices = @transform_1, window_bounds = array<i64: 1, 4, 1>}, {pipeline_mode = #tpu.pipeline_mode<synchronous>, transform_indices = @transform_2, window_bounds = array<i64: 4, 4>}, {pipeline_mode = #tpu.pipeline_mode<synchronous>, transform_indices = @transform_3, window_bounds = array<i64: 4, 1>}, {pipeline_mode = #tpu.pipeline_mode<synchronous>, transform_indices = @transform_4, window_bounds = array<i64: 4, 1>}, {transform_indices = @transform_5, window_bounds = array<i64: 1, 4, 256>}, {transform_indices = @transform_6, window_bounds = array<i64: 1, 4, 256>}]} {
    %c0 = arith.constant 0 : index
    %c0_0 = arith.constant 0 : index
    %c0_1 = arith.constant 0 : index
    %0 = vector.load %arg2[%c0, %c0_0, %c0_1] : memref<1x4x256xf32, #tpu.memory_space<vmem>>, vector<1x4x256xf32>
    %1 = vector.shape_cast %0 : vector<1x4x256xf32> to vector<4x256xf32>
    %c0_2 = arith.constant 0 : index
    %c0_3 = arith.constant 0 : index
    %c0_4 = arith.constant 0 : index
    %2 = vector.load %arg3[%c0_2, %c0_3, %c0_4] : memref<1x4x1xf32, #tpu.memory_space<vmem>>, vector<1x4x1xf32>
    %3 = vector.shape_cast %2 : vector<1x4x1xf32> to vector<4x1xf32>
    %c0_5 = arith.constant 0 : index
    %c0_6 = arith.constant 0 : index
    %4 = vector.load %arg4[%c0_5, %c0_6] : memref<4x4xf32, #tpu.memory_space<vmem>>, vector<4x4xf32>
    %5 = vector.broadcast %3 : vector<4x1xf32> to vector<4x256xf32>
    %6 = arith.mulf %1, %5 : vector<4x256xf32>
    %cst = arith.constant dense<0.000000e+00> : vector<4x256xf32>
    %7 = tpu.matmul %4, %6, %cst {dimension_numbers = #tpu.dot_dimension_numbers<[1], [0], [0], [1], [0, 0, 1, 1], [], []>} : vector<4x4xf32>, vector<4x256xf32>, vector<4x256xf32> -> vector<4x256xf32>
    %c0_7 = arith.constant 0 : index
    %c0_8 = arith.constant 0 : index
    %8 = vector.load %arg5[%c0_7, %c0_8] : memref<4x1xf32, #tpu.memory_space<vmem>>, vector<4x1xf32>
    %9 = vector.broadcast %8 : vector<4x1xf32> to vector<4x256xf32>
    %10 = arith.addf %7, %9 : vector<4x256xf32>
    %c0_9 = arith.constant 0 : index
    %c0_10 = arith.constant 0 : index
    %c0_11 = arith.constant 0 : index
    %11 = vector.load %arg7[%c0_9, %c0_10, %c0_11] : memref<1x4x256xf32, #tpu.memory_space<vmem>>, vector<1x4x256xf32>
    %12 = vector.shape_cast %11 : vector<1x4x256xf32> to vector<4x256xf32>
    %c0_12 = arith.constant 0 : index
    %c0_13 = arith.constant 0 : index
    %13 = vector.load %arg6[%c0_12, %c0_13] : memref<4x1xf32, #tpu.memory_space<vmem>>, vector<4x1xf32>
    %14 = vector.broadcast %13 : vector<4x1xf32> to vector<4x256xf32>
    %15 = arith.mulf %10, %14 : vector<4x256xf32>
    %16 = arith.addf %12, %15 : vector<4x256xf32>
    %c0_14 = arith.constant 0 : index
    %c0_15 = arith.constant 0 : index
    %c0_16 = arith.constant 0 : index
    %17 = vector.load %arg8[%c0_14, %c0_15, %c0_16] : memref<1x4x256xf32, #tpu.memory_space<vmem>>, vector<1x4x256xf32>
    %18 = vector.shape_cast %17 : vector<1x4x256xf32> to vector<4x256xf32>
    %19 = vector.shape_cast %16 : vector<4x256xf32> to vector<1x4x256xf32>
    tpu.vector_store %arg8[%c0_14, %c0_15, %c0_16], %19 {strides = array<i32>} : memref<1x4x256xf32, #tpu.memory_space<vmem>>, vector<1x4x256xf32>,
    return
  }
  func.func @transform_0(%arg0: i32, %arg1: i32) -> (i32, i32, i32) {
    %c0_i32 = arith.constant 0 : i32
    %c0_i32_0 = arith.constant 0 : i32
    return %arg0, %c0_i32, %arg1 : i32, i32, i32
  }
  func.func @transform_1(%arg0: i32, %arg1: i32) -> (i32, i32, i32) {
    %c0_i32 = arith.constant 0 : i32
    %c0_i32_0 = arith.constant 0 : i32
    %c0_i32_1 = arith.constant 0 : i32
    return %arg0, %c0_i32, %c0_i32_0 : i32, i32, i32
  }
  func.func @transform_2(%arg0: i32, %arg1: i32) -> (i32, i32) {
    %c0_i32 = arith.constant 0 : i32
    %c0_i32_0 = arith.constant 0 : i32
    %c0_i32_1 = arith.constant 0 : i32
    return %c0_i32, %c0_i32_0 : i32, i32
  }
  func.func @transform_3(%arg0: i32, %arg1: i32) -> (i32, i32) {
    %c0_i32 = arith.constant 0 : i32
    %c0_i32_0 = arith.constant 0 : i32
    %c0_i32_1 = arith.constant 0 : i32
    return %c0_i32, %c0_i32_0 : i32, i32
  }
  func.func @transform_4(%arg0: i32, %arg1: i32) -> (i32, i32) {
    %c0_i32 = arith.constant 0 : i32
    %c0_i32_0 = arith.constant 0 : i32
    %c0_i32_1 = arith.constant 0 : i32
    return %c0_i32, %c0_i32_0 : i32, i32
  }
  func.func @transform_5(%arg0: i32, %arg1: i32) -> (i32, i32, i32) {
    %c0_i32 = arith.constant 0 : i32
    %c0_i32_0 = arith.constant 0 : i32
    return %arg0, %c0_i32, %arg1 : i32, i32, i32
  }
  func.func @transform_6(%arg0: i32, %arg1: i32) -> (i32, i32, i32) {
    %c0_i32 = arith.constant 0 : i32
    %c0_i32_0 = arith.constant 0 : i32
    return %arg0, %c0_i32, %arg1 : i32, i32, i32
  }
}

module attributes {stable_mosaic.version = 11 : i64} {
  func.func @_ffn_fused_kernel(%arg0: i32, %arg1: i32, %arg2: memref<1x4x256xf32, #tpu.memory_space<vmem>>, %arg3: memref<4x1xf32, #tpu.memory_space<vmem>>, %arg4: memref<4x1xf32, #tpu.memory_space<vmem>>, %arg5: memref<4x4xf32, #tpu.memory_space<vmem>>, %arg6: memref<4x4xf32, #tpu.memory_space<vmem>>, %arg7: memref<4x1xf32, #tpu.memory_space<vmem>>, %arg8: memref<4x1xf32, #tpu.memory_space<vmem>>, %arg9: memref<4x4xf32, #tpu.memory_space<vmem>>, %arg10: memref<4x1xf32, #tpu.memory_space<vmem>>, %arg11: memref<4x1xf32, #tpu.memory_space<vmem>>, %arg12: memref<1x4x256xf32, #tpu.memory_space<vmem>>) attributes {dimension_semantics = [#tpu.dimension_semantics<parallel>, #tpu.dimension_semantics<parallel>], iteration_bounds = array<i64: 2, 1>, scalar_prefetch = 0 : i64, scratch_operands = 0 : i64, tpu.core_type = #tpu.core_type<tc>, window_params = [{transform_indices = @transform_0, window_bounds = array<i64: 1, 4, 256>}, {pipeline_mode = #tpu.pipeline_mode<synchronous>, transform_indices = @transform_1, window_bounds = array<i64: 4, 1>}, {pipeline_mode = #tpu.pipeline_mode<synchronous>, transform_indices = @transform_2, window_bounds = array<i64: 4, 1>}, {pipeline_mode = #tpu.pipeline_mode<synchronous>, transform_indices = @transform_3, window_bounds = array<i64: 4, 4>}, {pipeline_mode = #tpu.pipeline_mode<synchronous>, transform_indices = @transform_4, window_bounds = array<i64: 4, 4>}, {pipeline_mode = #tpu.pipeline_mode<synchronous>, transform_indices = @transform_5, window_bounds = array<i64: 4, 1>}, {pipeline_mode = #tpu.pipeline_mode<synchronous>, transform_indices = @transform_6, window_bounds = array<i64: 4, 1>}, {pipeline_mode = #tpu.pipeline_mode<synchronous>, transform_indices = @transform_7, window_bounds = array<i64: 4, 4>}, {pipeline_mode = #tpu.pipeline_mode<synchronous>, transform_indices = @transform_8, window_bounds = array<i64: 4, 1>}, {pipeline_mode = #tpu.pipeline_mode<synchronous>, transform_indices = @transform_9, window_bounds = array<i64: 4, 1>}, {transform_indices = @transform_10, window_bounds = array<i64: 1, 4, 256>}]} {
    %c0 = arith.constant 0 : index
    %c0_0 = arith.constant 0 : index
    %c0_1 = arith.constant 0 : index
    %0 = vector.load %arg2[%c0, %c0_0, %c0_1] : memref<1x4x256xf32, #tpu.memory_space<vmem>>, vector<1x4x256xf32>
    %1 = vector.shape_cast %0 : vector<1x4x256xf32> to vector<4x256xf32>
    %cst = arith.constant dense<0.000000e+00> : vector<256xf32>
    %2 = vector.multi_reduction <add>, %1, %cst [0] : vector<4x256xf32> to vector<256xf32>
    %3 = vector.shape_cast %2 : vector<256xf32> to vector<1x256xf32>
    %cst_2 = arith.constant 4.000000e+00 : f32
    %4 = vector.broadcast %cst_2 : f32 to vector<1x256xf32>
    %5 = arith.divf %3, %4 : vector<1x256xf32>
    %6 = vector.broadcast %5 : vector<1x256xf32> to vector<4x256xf32>
    %7 = arith.subf %1, %6 : vector<4x256xf32>
    %8 = arith.mulf %7, %7 : vector<4x256xf32>
    %cst_3 = arith.constant dense<0.000000e+00> : vector<256xf32>
    %9 = vector.multi_reduction <add>, %8, %cst_3 [0] : vector<4x256xf32> to vector<256xf32>
    %10 = vector.shape_cast %9 : vector<256xf32> to vector<1x256xf32>
    %cst_4 = arith.constant 4.000000e+00 : f32
    %11 = vector.broadcast %cst_4 : f32 to vector<1x256xf32>
    %12 = arith.divf %10, %11 : vector<1x256xf32>
    %cst_5 = arith.constant 9.99999997E-7 : f32
    %13 = vector.broadcast %cst_5 : f32 to vector<1x256xf32>
    %14 = arith.addf %12, %13 : vector<1x256xf32>
    %15 = math.rsqrt %14 : vector<1x256xf32>
    %16 = vector.broadcast %15 : vector<1x256xf32> to vector<4x256xf32>
    %17 = arith.mulf %7, %16 : vector<4x256xf32>
    %c0_6 = arith.constant 0 : index
    %c0_7 = arith.constant 0 : index
    %18 = vector.load %arg3[%c0_6, %c0_7] : memref<4x1xf32, #tpu.memory_space<vmem>>, vector<4x1xf32>
    %19 = vector.broadcast %18 : vector<4x1xf32> to vector<4x256xf32>
    %20 = arith.mulf %17, %19 : vector<4x256xf32>
    %c0_8 = arith.constant 0 : index
    %c0_9 = arith.constant 0 : index
    %21 = vector.load %arg4[%c0_8, %c0_9] : memref<4x1xf32, #tpu.memory_space<vmem>>, vector<4x1xf32>
    %22 = vector.broadcast %21 : vector<4x1xf32> to vector<4x256xf32>
    %23 = arith.addf %20, %22 : vector<4x256xf32>
    %c0_10 = arith.constant 0 : index
    %c0_11 = arith.constant 0 : index
    %24 = vector.load %arg5[%c0_10, %c0_11] : memref<4x4xf32, #tpu.memory_space<vmem>>, vector<4x4xf32>
    %cst_12 = arith.constant dense<0.000000e+00> : vector<4x256xf32>
    %25 = tpu.matmul %24, %23, %cst_12 {dimension_numbers = #tpu.dot_dimension_numbers<[1], [0], [0], [1], [0, 0, 1, 1], [], []>} : vector<4x4xf32>, vector<4x256xf32>, vector<4x256xf32> -> vector<4x256xf32>
    %c0_13 = arith.constant 0 : index
    %c0_14 = arith.constant 0 : index
    %26 = vector.load %arg7[%c0_13, %c0_14] : memref<4x1xf32, #tpu.memory_space<vmem>>, vector<4x1xf32>
    %27 = vector.broadcast %26 : vector<4x1xf32> to vector<4x256xf32>
    %28 = arith.addf %25, %27 : vector<4x256xf32>
    %c0_15 = arith.constant 0 : index
    %c0_16 = arith.constant 0 : index
    %29 = vector.load %arg6[%c0_15, %c0_16] : memref<4x4xf32, #tpu.memory_space<vmem>>, vector<4x4xf32>
    %cst_17 = arith.constant dense<0.000000e+00> : vector<4x256xf32>
    %30 = tpu.matmul %29, %23, %cst_17 {dimension_numbers = #tpu.dot_dimension_numbers<[1], [0], [0], [1], [0, 0, 1, 1], [], []>} : vector<4x4xf32>, vector<4x256xf32>, vector<4x256xf32> -> vector<4x256xf32>
    %c0_18 = arith.constant 0 : index
    %c0_19 = arith.constant 0 : index
    %31 = vector.load %arg8[%c0_18, %c0_19] : memref<4x1xf32, #tpu.memory_space<vmem>>, vector<4x1xf32>
    %32 = vector.broadcast %31 : vector<4x1xf32> to vector<4x256xf32>
    %33 = arith.addf %30, %32 : vector<4x256xf32>
    %34 = arith.mulf %28, %33 : vector<4x256xf32>
    %c0_20 = arith.constant 0 : index
    %c0_21 = arith.constant 0 : index
    %35 = vector.load %arg9[%c0_20, %c0_21] : memref<4x4xf32, #tpu.memory_space<vmem>>, vector<4x4xf32>
    %cst_22 = arith.constant dense<0.000000e+00> : vector<4x256xf32>
    %36 = tpu.matmul %35, %34, %cst_22 {dimension_numbers = #tpu.dot_dimension_numbers<[1], [0], [0], [1], [0, 0, 1, 1], [], []>} : vector<4x4xf32>, vector<4x256xf32>, vector<4x256xf32> -> vector<4x256xf32>
    %c0_23 = arith.constant 0 : index
    %c0_24 = arith.constant 0 : index
    %37 = vector.load %arg10[%c0_23, %c0_24] : memref<4x1xf32, #tpu.memory_space<vmem>>, vector<4x1xf32>
    %38 = vector.broadcast %37 : vector<4x1xf32> to vector<4x256xf32>
    %39 = arith.addf %36, %38 : vector<4x256xf32>
    %c0_25 = arith.constant 0 : index
    %c0_26 = arith.constant 0 : index
    %40 = vector.load %arg11[%c0_25, %c0_26] : memref<4x1xf32, #tpu.memory_space<vmem>>, vector<4x1xf32>
    %41 = vector.broadcast %40 : vector<4x1xf32> to vector<4x256xf32>
    %42 = arith.mulf %39, %41 : vector<4x256xf32>
    %43 = arith.addf %1, %42 : vector<4x256xf32>
    %c0_27 = arith.constant 0 : index
    %c0_28 = arith.constant 0 : index
    %c0_29 = arith.constant 0 : index
    %44 = vector.load %arg12[%c0_27, %c0_28, %c0_29] : memref<1x4x256xf32, #tpu.memory_space<vmem>>, vector<1x4x256xf32>
    %45 = vector.shape_cast %44 : vector<1x4x256xf32> to vector<4x256xf32>
    %46 = vector.shape_cast %43 : vector<4x256xf32> to vector<1x4x256xf32>
    tpu.vector_store %arg12[%c0_27, %c0_28, %c0_29], %46 {strides = array<i32>} : memref<1x4x256xf32, #tpu.memory_space<vmem>>, vector<1x4x256xf32>,
    return
  }
  func.func @transform_0(%arg0: i32, %arg1: i32) -> (i32, i32, i32) {
    %c0_i32 = arith.constant 0 : i32
    %c0_i32_0 = arith.constant 0 : i32
    return %arg0, %c0_i32, %arg1 : i32, i32, i32
  }
  func.func @transform_1(%arg0: i32, %arg1: i32) -> (i32, i32) {
    %c0_i32 = arith.constant 0 : i32
    %c0_i32_0 = arith.constant 0 : i32
    %c0_i32_1 = arith.constant 0 : i32
    return %c0_i32, %c0_i32_0 : i32, i32
  }
  func.func @transform_2(%arg0: i32, %arg1: i32) -> (i32, i32) {
    %c0_i32 = arith.constant 0 : i32
    %c0_i32_0 = arith.constant 0 : i32
    %c0_i32_1 = arith.constant 0 : i32
    return %c0_i32, %c0_i32_0 : i32, i32
  }
  func.func @transform_3(%arg0: i32, %arg1: i32) -> (i32, i32) {
    %c0_i32 = arith.constant 0 : i32
    %c0_i32_0 = arith.constant 0 : i32
    %c0_i32_1 = arith.constant 0 : i32
    return %c0_i32, %c0_i32_0 : i32, i32
  }
  func.func @transform_4(%arg0: i32, %arg1: i32) -> (i32, i32) {
    %c0_i32 = arith.constant 0 : i32
    %c0_i32_0 = arith.constant 0 : i32
    %c0_i32_1 = arith.constant 0 : i32
    return %c0_i32, %c0_i32_0 : i32, i32
  }
  func.func @transform_5(%arg0: i32, %arg1: i32) -> (i32, i32) {
    %c0_i32 = arith.constant 0 : i32
    %c0_i32_0 = arith.constant 0 : i32
    %c0_i32_1 = arith.constant 0 : i32
    return %c0_i32, %c0_i32_0 : i32, i32
  }
  func.func @transform_6(%arg0: i32, %arg1: i32) -> (i32, i32) {
    %c0_i32 = arith.constant 0 : i32
    %c0_i32_0 = arith.constant 0 : i32
    %c0_i32_1 = arith.constant 0 : i32
    return %c0_i32, %c0_i32_0 : i32, i32
  }
  func.func @transform_7(%arg0: i32, %arg1: i32) -> (i32, i32) {
    %c0_i32 = arith.constant 0 : i32
    %c0_i32_0 = arith.constant 0 : i32
    %c0_i32_1 = arith.constant 0 : i32
    return %c0_i32, %c0_i32_0 : i32, i32
  }
  func.func @transform_8(%arg0: i32, %arg1: i32) -> (i32, i32) {
    %c0_i32 = arith.constant 0 : i32
    %c0_i32_0 = arith.constant 0 : i32
    %c0_i32_1 = arith.constant 0 : i32
    return %c0_i32, %c0_i32_0 : i32, i32
  }
  func.func @transform_9(%arg0: i32, %arg1: i32) -> (i32, i32) {
    %c0_i32 = arith.constant 0 : i32
    %c0_i32_0 = arith.constant 0 : i32
    %c0_i32_1 = arith.constant 0 : i32
    return %c0_i32, %c0_i32_0 : i32, i32
  }
  func.func @transform_10(%arg0: i32, %arg1: i32) -> (i32, i32, i32) {
    %c0_i32 = arith.constant 0 : i32
    %c0_i32_0 = arith.constant 0 : i32
    return %arg0, %c0_i32, %arg1 : i32, i32, i32
  }
}

</mosaic_0001>

<bundles_post_ra>
// kernel: nafblock_forward.4
= control target key start
LH: loop header
LB: loop body
LE: loop exit
PB: predicated region body
PF: predicated region fallthrough
CT: control target
= control target key end

     0   :  { %s691_s21 = smov 0   ;;  %s693_s22 = smov 0   ;;  %s739_s0 = inlined_call_operand.vmem [shape: f32[2,4,256], index: 0, kind: input, shape index: {}]   ;;  %s740_s1 = inlined_call_operand.vmem [shape: f32[2,4,1], index: 1, kind: input, shape index: {}]   ;;  %s741_s2 = inlined_call_operand.vmem [shape: f32[4,4], index: 2, kind: input, shape index: {}]   ;;  %s742_s3 = inlined_call_operand.vmem [shape: f32[4,1], index: 3, kind: input, shape index: {}]   ;;  %s743_s4 = inlined_call_operand.vmem [shape: f32[4,1], index: 4, kind: input, shape index: {}]   ;;  %s744_s5 = inlined_call_operand.vmem [shape: f32[2,4,256], index: 5, kind: input, shape index: {}]   ;;  %s745_s6 = inlined_call_operand.vmem [shape: f32[2,4,256], index: 6, kind: output, shape index: {}]  }
   0x1   :  { %s695_s23 = smov 0  }
   0x2 LB: > { %s28_s24 = sadd.s32 1, %s647_s22  ;;  %p584_p0 = scmp.ge.s32.totalorder %s651_s23, 1  ;;  %s651_s23 = sphi %s695_s23, %s16_s23   ;;  %s647_s22 = sphi %s693_s22, %s747_s22   ;;  %s643_s21 = sphi %s691_s21, %s746_s21  }
   0x3   : > { %p30_p1 = scmp.ge.s32.totalorder %s28_s24, 2  ;;  %p259_p2 = scmp.lt.s32.totalorder %s651_s23, 3 }
   0x5   : > { %s749_s24 = smov (%p30_p1, %s28_s24), 0  ;;  %p260_p3 = pnand %p584_p0, %p259_p2 }
   0x6   : > { %p311_p4 = scmp.lt.s32.totalorder (!%p260_p3), %s643_s21, 1  ;;  %v653_v0 = vmov (!%p260_p3), 0   ;;  %v360_v2 = vld [vmem:[%s742_s3] sm:$0xf] (!%p260_p3)  ;;  %v654_v3 = vmov (!%p260_p3), 0.0   ;;  %v354_v7 = vlaneseq (!%p260_p3)  ;;  %vm372_vm0 = vcmask (!%p260_p3), 1043456  }
   0x7   : > { %263 = sbr.rel (%p260_p3) target bundleno = 376 (0x178), region = 44  ;;  %627 = vset.pattern.permute.xlu0 (!%p260_p3), %v653_v0  ;;  %628 = vset.pattern.permute.xlu1 (!%p260_p3), %v653_v0  ;;  %v449_v4 = vld [vmem:[%s743_s4] sm:$0xf] (!%p260_p3)  ;;  %v655_v5 = vmov (!%p260_p3), 839922192   ;;  %vm368_vm1 = vcmask (!%p260_p3), 31744  }
   0x8   : > { %441 = vmatprep.mubr.f32.mxu0 (!%p260_p3), %v654_v3  ;;  %452 = vperm.xlu1 (!%p260_p3), %628, %v449_v4   ;;  %v352_v6 = vunpack.c.l.s4 (!%p260_p3), %v655_v5  ;;  %v355_v9 = vshrl.u32 (!%p260_p3), %v354_v7, 7  ;;  %v346_v16 = vld [vmem:[%s741_s2] sm:$0xf] (!%p260_p3) }
   0xa   : > { %v353_v8 = vunpack.c.0.s8 (!%p260_p3), %v352_v6 }
   0xc   : > { %v356_v10 = vsub.s32 (!%p260_p3), %v353_v8, %v355_v9 }
   0xe   : > { %s751_s21 = smov (!%p311_p4, %s643_s21), 1 }
   0xf   : > { %s587_s25 = sshll.u32 %s751_s21, 2  ;;  %s597_s9 = sshll.u32 %s751_s21, 3 }
  0x10   : > { %s323_s28 = scalar_lea.vmem %s740_s1, %s587_s25  ;;  %s318_s12 = scalar_lea.vmem %s739_s0, %s597_s9 }
  0x11   : > { %v345_v1 = vld [vmem:[%s323_s28] sm:$0xf]  ;;  %s332_s17 = scalar_lea.vmem %s744_s5, %s597_s9  ;;  %s342_s20 = scalar_lea.vmem %s745_s6, %s597_s9 }
  0x12   : > { %349 = vperm.xlu0 %627, %v345_v1   ;;  %v344_v12 = vld [vmem:[%s318_s12] sm:$0xff] }
  0x13   : > { %v448_v25 = vld [vmem:[%s332_s17] sm:$0xff] }
  0x16   : > { %363 = vperm.xlu0 %627, %v360_v2  }
  0x87   : > { %v453_v19 = vpop.permute.xlu1 %452 }
  0x91   : > { %v350_v11 = vpop.permute.xlu0 %349 }
  0x92   : > { %v357_v13 = vrot.slane %v350_v11, %v356_v10 }
  0x94   : > { %v359_v14 = vmul.f32 %v357_v13, %v344_v12 }
  0x95   : > { %v364_v17 = vpop.permute.xlu0 %363 }
  0x96   : > { %v367_v15 = vcombine.high %v359_v14, %v359_v14 }
  0x98   : > { %592 = vmatprep.subr.msk.mxu0 %vm372_vm0, %v367_v15 }
  0x99   : > { %593 = vmatpush1.msk.msra.mxu0 %vm372_vm0, %v359_v14 }
  0x9a   : > { %594 = vmatmul.mubr.msk.f32.vlgmr.msra.gmra.mrb[0].mxu0 %vm368_vm1, %v346_v16 }
 0x16d   : > { %v443_v18 = vpop.f32.mrb[0].mxu0 }
 0x16e   : > { %v444_v20 = vadd.f32 %v443_v18, %v364_v17  ;;  %v445_v21 = vpop.f32.mrb[1].mxu0 }
 0x16f   : > { %v446_v22 = vadd.f32 %v445_v21, %v364_v17 }
 0x170   : > { %v455_v23 = vmul.f32 %v453_v19, %v444_v20 }
 0x171   : > { %v456_v24 = vmul.f32 %v453_v19, %v446_v22 }
 0x173   : > { %v459_v26 = vcombine.low %v455_v23, %v456_v24 }
 0x175   : > { %v461_v27 = vadd.f32 %v459_v26, %v448_v25 }
 0x177   : > { %462 = vst [vmem:[%s342_s20] sm:$0xff] %v461_v27 }
 0x178 PF: > { %s16_s23 = sadd.s32 1, %s651_s23   ;;  %s746_s21 = smov %s647_s22 }
 0x179   : > { %p13_p5 = scmp.ge.s32.totalorder %s16_s23, 4   ;;  %s747_s22 = smov %s749_s24 }
 0x17b   :  { %15 = sbr.rel (!%p13_p5) target bundleno = 2 (0x2), region = 80 }

// kernel: nafblock_forward.5
= control target key start
LH: loop header
LB: loop body
LE: loop exit
PB: predicated region body
PF: predicated region fallthrough
CT: control target
= control target key end

     0   :  { %s980_s13 = smov 0   ;;  %s982_s14 = smov 0   ;;  %s1070_s0 = inlined_call_operand.vmem [shape: f32[2,4,256], index: 0, kind: input, shape index: {}]   ;;  %s1071_s1 = inlined_call_operand.vmem [shape: f32[4,1], index: 1, kind: input, shape index: {}]   ;;  %s1072_s2 = inlined_call_operand.vmem [shape: f32[4,1], index: 2, kind: input, shape index: {}]   ;;  %s1073_s3 = inlined_call_operand.vmem [shape: f32[4,4], index: 3, kind: input, shape index: {}]   ;;  %s1074_s4 = inlined_call_operand.vmem [shape: f32[4,4], index: 4, kind: input, shape index: {}]   ;;  %s1075_s5 = inlined_call_operand.vmem [shape: f32[4,1], index: 5, kind: input, shape index: {}]   ;;  %s1076_s6 = inlined_call_operand.vmem [shape: f32[4,1], index: 6, kind: input, shape index: {}]   ;;  %s1077_s7 = inlined_call_operand.vmem [shape: f32[4,4], index: 7, kind: input, shape index: {}]   ;;  %s1078_s8 = inlined_call_operand.vmem [shape: f32[4,1], index: 8, kind: input, shape index: {}]   ;;  %s1079_s9 = inlined_call_operand.vmem [shape: f32[4,1], index: 9, kind: input, shape index: {}]   ;;  %s1080_s10 = inlined_call_operand.vmem [shape: f32[2,4,256], index: 10, kind: output, shape index: {}]  }
   0x1   :  { %s984_s15 = smov 0  }
   0x2 LB: > { %s32_s16 = sadd.s32 1, %s916_s14  ;;  %p846_p0 = scmp.ge.s32.totalorder %s920_s15, 1  ;;  %s920_s15 = sphi %s984_s15, %s20_s15   ;;  %s916_s14 = sphi %s982_s14, %s1082_s14   ;;  %s912_s13 = sphi %s980_s13, %s1081_s13  }
   0x3   : > { %p34_p1 = scmp.ge.s32.totalorder %s32_s16, 2  ;;  %p333_p2 = scmp.lt.s32.totalorder %s920_s15, 3 }
   0x5   : > { %s1084_s16 = smov (%p34_p1, %s32_s16), 0  ;;  %p334_p3 = pnand %p846_p0, %p333_p2 }
   0x6   : > { %v455_v0 = vld [vmem:[%s1071_s1] sm:$0xf] (!%p334_p3)  ;;  %v922_v1 = vmov (!%p334_p3), 0   ;;  %p380_p4 = scmp.lt.s32.totalorder (!%p334_p3), %s912_s13, 1  ;;  %v923_v4 = vmov (!%p334_p3), 0.0   ;;  %vm403_vm0 = vcmask (!%p334_p3), 1043456   ;;  %v463_v50 = vlaneseq (!%p334_p3) }
   0x7   : > { %337 = sbr.rel (%p334_p3) target bundleno = 589 (0x24d), region = 60  ;;  %891 = vset.pattern.permute.xlu0 (!%p334_p3), %v922_v1  ;;  %892 = vset.pattern.permute.xlu1 (!%p334_p3), %v922_v1  ;;  %v469_v2 = vld [vmem:[%s1072_s2] sm:$0xf] (!%p334_p3)  ;;  %v924_v48 = vmov (!%p334_p3), 839922192   ;;  %vm492_vm1 = vcmask (!%p334_p3), 31744  }
   0x8   : > { %458 = vperm.xlu0 (!%p334_p3), %891, %v455_v0   ;;  %v655_v3 = vld [vmem:[%s1078_s8] sm:$0xf] (!%p334_p3)  ;;  %564 = vmatprep.mubr.f32.mxu0 (!%p334_p3), %v923_v4  ;;  %v461_v49 = vunpack.c.l.s4 (!%p334_p3), %v924_v48  ;;  %v464_v53 = vshrl.u32 (!%p334_p3), %v463_v50, 7 }
   0x9   : > { %645 = vmatprep.mubr.f32.mxu1 (!%p334_p3), %v923_v4  ;;  %v484_v5 = vld [vmem:[%s1075_s5] sm:$0xf] (!%p334_p3) }
   0xa   : > { %487 = vperm.xlu1 (!%p334_p3), %892, %v484_v5   ;;  %v572_v6 = vld [vmem:[%s1076_s6] sm:$0xf] (!%p334_p3)  ;;  %v462_v52 = vunpack.c.0.s8 (!%p334_p3), %v461_v49 }
   0xb   : > { %v741_v7 = vld [vmem:[%s1079_s9] sm:$0xf] (!%p334_p3) }
   0xc   : > { %472 = vperm.xlu0 (!%p334_p3), %891, %v469_v2   ;;  %v465_v55 = vsub.s32 (!%p334_p3), %v462_v52, %v464_v53  ;;  %v483_v1 = vld [vmem:[%s1073_s3] sm:$0xf] (!%p334_p3) }
   0xd   : > { %v571_v2 = vld [vmem:[%s1074_s4] sm:$0xf] (!%p334_p3) }
   0xe   : > { %s1086_s13 = smov (!%p380_p4, %s912_s13), 1  ;;  %575 = vperm.xlu1 %892, %v572_v6  }
   0xf   : > { %s862_s27 = sshll.u32 %s1086_s13, 3 }
  0x10   : > { %658 = vperm.xlu0 %891, %v655_v3   ;;  %s387_s12 = scalar_lea.vmem %s1070_s0, %s862_s27  ;;  %s397_s25 = scalar_lea.vmem %s1080_s10, %s862_s27 }
  0x11   : > { %v1026_v8 = vld [vmem:[%s387_s12] sm:$0xff] }
  0x12   : > { %744 = vperm.xlu1 %892, %v741_v7   ;;  %v401_v9 = vcombine.high %v1026_v8, %v1026_v8  ;;  %v404_v10 = vsel %vm403_vm0, %v1026_v8, 0.0 }
  0x13   : > { %v405_v12 = vrot.slane %v404_v10, 4 }
  0x14   : > { %v411_v11 = vsel %vm403_vm0, %v401_v9, 0.0 }
  0x15   : > { %v412_v13 = vrot.slane %v411_v11, 4  ;;  %v406_v14 = vadd.f32 %v405_v12, %v404_v10 }
  0x17   : > { %v413_v15 = vadd.f32 %v412_v13, %v411_v11  ;;  %v407_v16 = vrot.slane %v406_v14, 2 }
  0x19   : > { %v414_v17 = vrot.slane %v413_v15, 2  ;;  %v408_v18 = vadd.f32 %v407_v16, %v406_v14 }
  0x1b   : > { %v415_v19 = vadd.f32 %v414_v17, %v413_v15  ;;  %v409_v20 = vrot.slane %v408_v18, 1  ;;  %v654_v17 = vld [vmem:[%s1077_s7] sm:$0xf] }
  0x1d   : > { %v416_v21 = vrot.slane %v415_v19, 1  ;;  %v410_v22 = vadd.f32 %v409_v20, %v408_v18 }
  0x1f   : > { %v417_v23 = vadd.f32 %v416_v21, %v415_v19  ;;  %v419_v24 = vmul.f32 0.25, %v410_v22 }
  0x21   : > { %v420_v25 = vmul.f32 0.25, %v417_v23 }
  0x23   : > { %v423_v26 = vcombine.low %v419_v24, %v420_v25 }
  0x25   : > { %v425_v27 = vsub.f32 %v1026_v8, %v423_v26 }
  0x27   : > { %v426_v28 = vmul.f32 %v425_v27, %v425_v27 }
  0x29   : > { %v428_v29 = vcombine.high %v426_v28, %v426_v28  ;;  %v430_v30 = vsel %vm403_vm0, %v426_v28, 0.0 }
  0x2a   : > { %v431_v32 = vrot.slane %v430_v30, 4 }
  0x2b   : > { %v437_v31 = vsel %vm403_vm0, %v428_v29, 0.0 }
  0x2c   : > { %v438_v33 = vrot.slane %v437_v31, 4  ;;  %v432_v34 = vadd.f32 %v431_v32, %v430_v30 }
  0x2e   : > { %v439_v35 = vadd.f32 %v438_v33, %v437_v31  ;;  %v433_v36 = vrot.slane %v432_v34, 2 }
  0x30   : > { %v440_v37 = vrot.slane %v439_v35, 2  ;;  %v434_v38 = vadd.f32 %v433_v36, %v432_v34 }
  0x32   : > { %v441_v39 = vadd.f32 %v440_v37, %v439_v35  ;;  %v435_v40 = vrot.slane %v434_v38, 1 }
  0x34   : > { %v442_v41 = vrot.slane %v441_v39, 1  ;;  %v436_v42 = vadd.f32 %v435_v40, %v434_v38 }
  0x36   : > { %v443_v43 = vadd.f32 %v442_v41, %v441_v39  ;;  %v444_v44 = vmul.f32 0.25, %v436_v42 }
  0x38   : > { %v445_v45 = vmul.f32 0.25, %v443_v43  ;;  %v446_v46 = vadd.f32 1e-06, %v444_v44 }
  0x3a   : > { %v447_v47 = vadd.f32 1e-06, %v445_v45  ;;  %894 = vrsqrt.f32 %v446_v46 }
  0x3c   : > { %896 = vrsqrt.f32 %v447_v47 }
  0x44   : > { %v895_v51 = vpop.eup %894 }
  0x46   : > { %v897_v54 = vpop.eup %896 }
  0x47   : > { %v452_v56 = vcombine.low %v895_v51, %v897_v54 }
  0x49   : > { %v454_v58 = vmul.f32 %v452_v56, %v425_v27 }
  0x87   : > { %v459_v57 = vpop.permute.xlu0 %458 }
  0x88   : > { %v466_v59 = vrot.slane %v459_v57, %v465_v55 }
  0x89   : > { %v488_v3 = vpop.permute.xlu1 %487 }
  0x8a   : > { %v468_v61 = vmul.f32 %v466_v59, %v454_v58 }
  0x8b   : > { %v473_v60 = vpop.permute.xlu0 %472 }
  0x8c   : > { %v480_v62 = vrot.slane %v473_v60, %v465_v55 }
  0x8d   : > { %v576_v5 = vpop.permute.xlu1 %575 }
  0x8e   : > { %v482_v63 = vadd.f32 %v480_v62, %v468_v61 }
  0x90   : > { %v491_v0 = vcombine.high %v482_v63, %v482_v63 }
  0x91   : > { %v745_v21 = vpop.permute.xlu1 %744 }
  0x92   : > { %851 = vmatprep.subr.msk.mxu0 %vm403_vm0, %v491_v0  ;;  %854 = vmatprep.subr.msk.mxu1 %vm403_vm0, %v491_v0 }
  0x93   : > { %852 = vmatpush1.msk.msra.mxu0 %vm403_vm0, %v482_v63  ;;  %855 = vmatpush1.msk.msra.mxu1 %vm403_vm0, %v482_v63 }
  0x94   : > { %853 = vmatmul.mubr.msk.f32.vlgmr.msra.gmra.mrb[0].mxu0 %vm492_vm1, %v483_v1  ;;  %856 = vmatmul.mubr.msk.f32.vlgmr.msra.gmra.mrb[0].mxu1 %vm492_vm1, %v571_v2 }
  0x95   : > { %734 = vmatprep.mubr.f32.mxu0 %v923_v4  ;;  %v659_v4 = vpop.permute.xlu0 %658 }
 0x167   : > { %v566_v6 = vpop.f32.mrb[0].mxu0  ;;  %v647_v7 = vpop.f32.mrb[0].mxu1 }
 0x168   : > { %v567_v9 = vadd.f32 %v566_v6, %v488_v3  ;;  %v648_v10 = vadd.f32 %v647_v7, %v576_v5  ;;  %v568_v11 = vpop.f32.mrb[1].mxu0  ;;  %v649_v12 = vpop.f32.mrb[1].mxu1 }
 0x169   : > { %v569_v13 = vadd.f32 %v568_v11, %v488_v3  ;;  %v650_v14 = vadd.f32 %v649_v12, %v576_v5 }
 0x16a   : > { %v652_v15 = vmul.f32 %v648_v10, %v567_v9 }
 0x16b   : > { %v653_v16 = vmul.f32 %v650_v14, %v569_v13 }
 0x16d   : > { %857 = vmatprep.subr.msk.mxu0 %vm403_vm0, %v653_v16 }
 0x16e   : > { %858 = vmatpush1.msk.msra.mxu0 %vm403_vm0, %v652_v15 }
 0x16f   : > { %859 = vmatmul.mubr.msk.f32.vlgmr.msra.gmra.mrb[2].mxu0 %vm492_vm1, %v654_v17 }
 0x242   : > { %v736_v18 = vpop.f32.mrb[2].mxu0 }
 0x243   : > { %v737_v19 = vadd.f32 %v736_v18, %v659_v4  ;;  %v738_v20 = vpop.f32.mrb[3].mxu0 }
 0x244   : > { %v739_v22 = vadd.f32 %v738_v20, %v659_v4 }
 0x245   : > { %v747_v23 = vmul.f32 %v745_v21, %v737_v19 }
 0x246   : > { %v748_v24 = vmul.f32 %v745_v21, %v739_v22 }
 0x248   : > { %v751_v25 = vcombine.low %v747_v23, %v748_v24 }
 0x24a   : > { %v753_v26 = vadd.f32 %v751_v25, %v1026_v8 }
 0x24c   : > { %754 = vst [vmem:[%s397_s25] sm:$0xff] %v753_v26 }
 0x24d PF: > { %s20_s15 = sadd.s32 1, %s920_s15   ;;  %s1081_s13 = smov %s916_s14 }
 0x24e   : > { %p17_p5 = scmp.ge.s32.totalorder %s20_s15, 4   ;;  %s1082_s14 = smov %s1084_s16 }
 0x250   :  { %19 = sbr.rel (!%p17_p5) target bundleno = 2 (0x2), region = 90 }

// kernel: nafblock_forward.3
= control target key start
LH: loop header
LB: loop body
LE: loop exit
PB: predicated region body
PF: predicated region fallthrough
CT: control target
= control target key end

     0   :  { %s1373_s25 = smov 0   ;;  %s1939_s0 = inlined_call_operand.vmem [shape: f32[2,4,256], index: 0, kind: input, shape index: {}]   ;;  %s1940_s1 = inlined_call_operand.vmem [shape: s32[2,256], index: 1, kind: input, shape index: {}]   ;;  %s1941_s2 = inlined_call_operand.vmem [shape: f32[4,1], index: 2, kind: input, shape index: {}]   ;;  %s1942_s3 = inlined_call_operand.vmem [shape: f32[4,1], index: 3, kind: input, shape index: {}]   ;;  %s1943_s4 = inlined_call_operand.vmem [shape: f32[4,4], index: 4, kind: input, shape index: {}]   ;;  %s1944_s5 = inlined_call_operand.vmem [shape: f32[4,4], index: 5, kind: input, shape index: {}]   ;;  %s1945_s6 = inlined_call_operand.vmem [shape: f32[4,1], index: 6, kind: input, shape index: {}]   ;;  %s1946_s7 = inlined_call_operand.vmem [shape: f32[4,1], index: 7, kind: input, shape index: {}]   ;;  %s1947_s8 = inlined_call_operand.vmem [shape: f32[4,9], index: 8, kind: input, shape index: {}]   ;;  %s1948_s9 = inlined_call_operand.vmem [shape: f32[4,9], index: 9, kind: input, shape index: {}]   ;;  %s1949_s10 = inlined_call_operand.vmem [shape: f32[4,1], index: 10, kind: input, shape index: {}]   ;;  %s1950_s11 = inlined_call_operand.vmem [shape: f32[4,1], index: 11, kind: input, shape index: {}]   ;;  %s1951_s12 = inlined_call_operand.vmem [shape: f32[2,4,256], index: 12, kind: output, shape index: {0}]   ;;  %s1952_s13 = inlined_call_operand.vmem [shape: f32[2,4,1], index: 13, kind: output, shape index: {1}]  }
   0x1 LB: > { %s1204_s26 = sadd.s32 4294967295, %s1282_s25   ;;  %p1208_p0 = scmp.ge.s32.totalorder %s1282_s25, 1  ;;  %s1282_s25 = sphi %s1373_s25, %s24_s25  }
   0x2   : > { %p390_p1 = scmp.lt.s32.totalorder %s1282_s25, 3 }
   0x4   : > { %p391_p2 = pnand %p1208_p0, %p390_p1 }
   0x6   : > { %394 = sbr.rel (%p391_p2) target bundleno = 714 (0x2ca), region = 68 }
   0xd   : > { %v508_v0 = vld [vmem:[%s1941_s2] sm:$0xf]  ;;  %v1955_v1 = vmov 0   ;;  %p438_p3 = scmp.lt.s32.totalorder %s1204_s26, 1  ;;  %v1285_v3 = vmov 0.0   ;;  %v1286_v6 = vmov 4   ;;  %v516_v60 = vlaneseq }
   0xe   : > { %1252 = vset.pattern.permute.xlu0 %v1955_v1  ;;  %1253 = vset.pattern.permute.xlu1 %v1955_v1  ;;  %v522_v2 = vld [vmem:[%s1942_s3] sm:$0xf]  ;;  %v1287_v8 = vmov 2   ;;  %v1288_v11 = vmov 3   ;;  %vm1953_vm0 = vcmask 1043456   ;;  %v1289_v13 = vmov 5  }
   0xf   : > { %511 = vperm.xlu0 %1252, %v508_v0   ;;  %617 = vmatprep.mubr.f32.mxu0 %v1285_v3  ;;  %s2012_s26 = smov (!%p438_p3, %s1204_s26), 1  ;;  %v537_v4 = vld [vmem:[%s1945_s6] sm:$0xf]  ;;  %v1290_v16 = vmov 1   ;;  %v1291_v19 = vmov 6   ;;  %v1292_v22 = vmov 7  }
  0x10   : > { %698 = vmatprep.mubr.f32.mxu1 %v1285_v3  ;;  %540 = vperm.xlu1 %1253, %v537_v4   ;;  %v1397_v5 = vld [vmem:[%s1947_s8] sm:$0xf]  ;;  %s1223_s20 = sshll.u32 %s2012_s26, 3  ;;  %v1293_v25 = vmov 8   ;;  %v1294_v58 = vmov 839922192  }
  0x11   : > { %v625_v7 = vld [vmem:[%s1946_s7] sm:$0xf]  ;;  %s442_s23 = scalar_lea.vmem %s1939_s0, %s1223_s20  ;;  %v514_v59 = vunpack.c.l.s4 %v1294_v58  ;;  %v1433_v63 = vshrl.u32 %v516_v60, 7  ;;  %vm545_vm1 = vcmask 31744   ;;  %s1295_s19 = smov 16  }
  0x12   : > { %v452_v9 = vld [vmem:[%s442_s23] sm:$0xff]  ;;  %s1296_s21 = smov 17   ;;  %s1297_s22 = smov 1  }
  0x13   : > { %525 = vperm.xlu0 %1252, %v522_v2   ;;  %v958_v10 = vld [vmem:[%s1948_s9] sm:$0xf]  ;;  %v454_v12 = vcombine.high %v452_v9, %v452_v9  ;;  %v457_v14 = vsel %vm1953_vm0, %v452_v9, 0.0  ;;  %v515_v62 = vunpack.c.0.s8 %v514_v59  ;;  %s1298_s23 = smov 113   ;;  %s1299_s24 = smov 112   ;;  %v1556_v59 = vand.u32 127, %v516_v60 }
  0x14   : > { %628 = vperm.xlu1 %1253, %v625_v7   ;;  %v458_v17 = vrot.slane %v457_v14, 4  ;;  %v717_v30 = vld [vmem:[%s1949_s10] sm:$0xf]  ;;  %s1300_s27 = smov 15   ;;  %s1301_s28 = smov 127  }
  0x15   : > { %v464_v15 = vsel %vm1953_vm0, %v454_v12, 0.0  ;;  %v959_v37 = vld [vmem:[%s1950_s11] sm:$0xf]  ;;  %v518_v2 = vsub.s32 %v515_v62, %v1433_v63  ;;  %s1302_s29 = smov 111   ;;  %vm731_vm7 = vcmp.lt.s32.totalorder %v1556_v59, 17  ;;  %vm787_vm10 = vcmp.lt.s32.totalorder %v1556_v59, 15 }
  0x16   : > { %v465_v18 = vrot.slane %v464_v15, 4  ;;  %v459_v20 = vadd.f32 %v458_v17, %v457_v14  ;;  %v536_v12 = vld [vmem:[%s1943_s4] sm:$0xf]  ;;  %vm843_vm15 = vcmp.lt.s32.totalorder %v1556_v59, 127 }
  0x17   : > { %1254 = vset.pattern.permute.xlu0 %v1286_v6 }
  0x18   : > { %720 = vperm.xlu0 %1254, %v1397_v5   ;;  %748 = vperm.xlu1 %1253, %v1397_v5   ;;  %v466_v21 = vadd.f32 %v465_v18, %v464_v15  ;;  %v460_v23 = vrot.slane %v459_v20, 2 }
  0x1a   : > { %v467_v24 = vrot.slane %v466_v21, 2  ;;  %v461_v26 = vadd.f32 %v460_v23, %v459_v20 }
  0x1c   : > { %1257 = vset.pattern.permute.xlu0 %v1287_v8  ;;  %1255 = vset.pattern.permute.xlu1 %v1286_v6  ;;  %v468_v27 = vadd.f32 %v467_v24, %v466_v21  ;;  %v462_v28 = vrot.slane %v461_v26, 1 }
  0x1d   : > { %804 = vperm.xlu0 %1257, %v1397_v5   ;;  %962 = vperm.xlu1 %1255, %v958_v10  }
  0x1e   : > { %v469_v29 = vrot.slane %v468_v27, 1  ;;  %v463_v31 = vadd.f32 %v462_v28, %v461_v26 }
  0x20   : > { %v470_v32 = vadd.f32 %v469_v29, %v468_v27  ;;  %v472_v33 = vmul.f32 0.25, %v463_v31 }
  0x21   : > { %1260 = vset.pattern.permute.xlu0 %v1288_v11  ;;  %1256 = vset.pattern.permute.xlu1 %v1290_v16 }
  0x22   : > { %1024 = vperm.xlu0 %1260, %v958_v10   ;;  %776 = vperm.xlu1 %1256, %v1397_v5   ;;  %v473_v34 = vmul.f32 0.25, %v470_v32 }
  0x24   : > { %v476_v35 = vcombine.low %v472_v33, %v473_v34 }
  0x26   : > { %1261 = vset.pattern.permute.xlu0 %v1289_v13  ;;  %992 = vperm.xlu1 %1256, %v958_v10   ;;  %v478_v36 = vsub.f32 %v452_v9, %v476_v35 }
  0x27   : > { %860 = vperm.xlu0 %1261, %v1397_v5  }
  0x28   : > { %v479_v38 = vmul.f32 %v478_v36, %v478_v36 }
  0x2a   : > { %1258 = vset.pattern.permute.xlu1 %v1287_v8  ;;  %v481_v39 = vcombine.high %v479_v38, %v479_v38  ;;  %v483_v40 = vsel %vm1953_vm0, %v479_v38, 0.0 }
  0x2b   : > { %1264 = vset.pattern.permute.xlu0 %v1291_v19  ;;  %1008 = vperm.xlu1 %1258, %v958_v10   ;;  %v484_v42 = vrot.slane %v483_v40, 4 }
  0x2c   : > { %1056 = vperm.xlu0 %1264, %v958_v10   ;;  %v490_v41 = vsel %vm1953_vm0, %v481_v39, 0.0 }
  0x2d   : > { %v491_v43 = vrot.slane %v490_v41, 4  ;;  %v485_v44 = vadd.f32 %v484_v42, %v483_v40 }
  0x2f   : > { %1259 = vset.pattern.permute.xlu1 %v1288_v11  ;;  %v492_v45 = vadd.f32 %v491_v43, %v490_v41  ;;  %v486_v46 = vrot.slane %v485_v44, 2 }
  0x30   : > { %1265 = vset.pattern.permute.xlu0 %v1292_v22  ;;  %832 = vperm.xlu1 %1259, %v1397_v5  }
  0x31   : > { %916 = vperm.xlu0 %1265, %v1397_v5   ;;  %v493_v47 = vrot.slane %v492_v45, 2  ;;  %v487_v48 = vadd.f32 %v486_v46, %v485_v44 }
  0x33   : > { %v494_v49 = vadd.f32 %v493_v47, %v492_v45  ;;  %v488_v50 = vrot.slane %v487_v48, 1 }
  0x34   : > { %1262 = vset.pattern.permute.xlu1 %v1289_v13  ;;  %v624_v13 = vld [vmem:[%s1944_s5] sm:$0xf] }
  0x35   : > { %1268 = vset.pattern.permute.xlu0 %v1293_v25  ;;  %1040 = vperm.xlu1 %1262, %v958_v10   ;;  %v495_v51 = vrot.slane %v494_v49, 1  ;;  %v489_v52 = vadd.f32 %v488_v50, %v487_v48  ;;  %v1527_v48 = vld [vmem:[%s1940_s1] ss:$2 sm:$0x3] }
  0x36   : > { %1088 = vperm.xlu0 %1268, %v958_v10   ;;  %vm708_vm2 = vcmp.ge.s32.totalorder %v1527_v48, 1  ;;  %vm709_vm5 = vcmp.le.s32.totalorder %v1527_v48, 14 }
  0x37   : > { %v496_v53 = vadd.f32 %v495_v51, %v494_v49  ;;  %v497_v54 = vmul.f32 0.25, %v489_v52  ;;  %v1532_v49 = vld [vmem:[%s1940_s1 + $0x1] ss:$2 sm:$0x3] }
  0x38   : > { %vm710_vm3 = vcmp.ge.s32.totalorder %v1532_v49, 1  ;;  %vm1954_vm11 = vcmp.le.s32.totalorder %v1532_v49, 14 }
  0x39   : > { %1263 = vset.pattern.permute.xlu1 %v1291_v19  ;;  %v498_v55 = vmul.f32 0.25, %v496_v53  ;;  %v499_v56 = vadd.f32 1e-06, %v497_v54  ;;  %vm712_vm4 = vmand %vm710_vm3, %vm708_vm2  ;;  %v1547_v54 = vsub.s32 0, %v1433_v63 }
  0x3a   : > { %1269 = vset.pattern.permute.xlu0 %v1955_v1  ;;  %888 = vperm.xlu1 %1263, %v1397_v5   ;;  %v734_v58 = vsel %vm712_vm4, 1, %v1955_v1  ;;  %vm713_vm6 = vmand %vm710_vm3, %vm709_vm5 }
  0x3b   : > { %976 = vperm.xlu0 %1269, %v958_v10   ;;  %v500_v57 = vadd.f32 1e-06, %v498_v55  ;;  %1272 = vrsqrt.f32 %v499_v56  ;;  %v1550_v55 = vsub.s32 1, %v1433_v63  ;;  %vm715_vm14 = vmand %vm1954_vm11, %vm709_vm5 }
  0x3c   : > { %vm714_vm4 = vmand %vm1954_vm11, %vm708_vm2 }
  0x3d   : > { %1274 = vrsqrt.f32 %v500_v57  ;;  %v742_v62 = vrot.slane %v734_v58, %v1550_v55 }
  0x3e   : > { %1266 = vset.pattern.permute.xlu1 %v1292_v22 }
  0x3f   : > { %953 = vperm.xlu0 %1269, %v717_v30   ;;  %1072 = vperm.xlu1 %1266, %v958_v10   ;;  %vm1572_vm9 = vcmp.eq.s32.totalorder %v742_v62, 1 }
  0x43   : > { %1267 = vset.pattern.permute.xlu1 %v1293_v25 }
  0x44   : > { %944 = vperm.xlu1 %1267, %v1397_v5  }
  0x45   : > { %v1273_v61 = vpop.eup %1272 }
  0x47   : > { %v1275_v0 = vpop.eup %1274 }
  0x48   : > { %1270 = vset.pattern.permute.xlu1 %v1955_v1  ;;  %v505_v3 = vcombine.low %v1273_v61, %v1275_v0  ;;  %v738_v61 = vrot.slane %v734_v58, %v1547_v54 }
  0x49   : > { %1097 = vperm.xlu1 %1270, %v959_v37  }
  0x4a   : > { %v507_v5 = vmul.f32 %v505_v3, %v478_v36  ;;  %vm1568_vm8 = vcmp.eq.s32.totalorder %v738_v61, 1 }
  0x8e   : > { %v512_v4 = vpop.permute.xlu0 %511 }
  0x8f   : > { %v519_v6 = vrot.slane %v512_v4, %v518_v2  ;;  %v541_v14 = vpop.permute.xlu1 %540 }
  0x91   : > { %v521_v8 = vmul.f32 %v519_v6, %v507_v5  ;;  %v790_v5 = vsel %vm713_vm6, 1, %v1955_v1 }
  0x92   : > { %v526_v7 = vpop.permute.xlu0 %525 }
  0x93   : > { %v533_v9 = vrot.slane %v526_v7, %v518_v2  ;;  %v629_v15 = vpop.permute.xlu1 %628 }
  0x95   : > { %v535_v10 = vadd.f32 %v533_v9, %v521_v8 }
  0x97   : > { %v544_v11 = vcombine.high %v535_v10, %v535_v10  ;;  %v721_v16 = vpop.permute.xlu0 %720  ;;  %v749_v27 = vpop.permute.xlu1 %748 }
  0x99   : > { %1214 = vmatprep.subr.msk.mxu0 %vm1953_vm0, %v544_v11  ;;  %1217 = vmatprep.subr.msk.mxu1 %vm1953_vm0, %v544_v11 }
  0x9a   : > { %1215 = vmatpush1.msk.msra.mxu0 %vm1953_vm0, %v535_v10  ;;  %1218 = vmatpush1.msk.msra.mxu1 %vm1953_vm0, %v535_v10  ;;  %vm1982_vm0 = vcmp.lt.s32.totalorder %v1556_v59, 16 }
  0x9b   : > { %1216 = vmatmul.mubr.msk.f32.vlgmr.msra.gmra.mrb[0].mxu0 %vm545_vm1, %v536_v12  ;;  %1219 = vmatmul.mubr.msk.f32.vlgmr.msra.gmra.mrb[0].mxu1 %vm545_vm1, %v624_v13  ;;  %v794_v12 = vrot.slane %v790_v5, %v1547_v54  ;;  %v798_v13 = vrot.slane %v790_v5, %v1550_v55 }
  0x9c   : > { %v1480_v28 = vpop.permute.xlu1 %962  ;;  %v1487_v30 = vpop.permute.xlu0 %804 }
  0x9d   : > { %vm1611_vm12 = vcmp.eq.s32.totalorder %v794_v12, 1  ;;  %vm1615_vm13 = vcmp.eq.s32.totalorder %v798_v13, 1 }
  0xa1   : > { %v1484_v29 = vpop.permute.xlu1 %776  ;;  %v1496_v33 = vpop.permute.xlu0 %1024 }
  0xa5   : > { %v1491_v31 = vpop.permute.xlu1 %992 }
  0xa6   : > { %v1500_v35 = vpop.permute.xlu0 %860 }
  0xaa   : > { %v1494_v32 = vpop.permute.xlu1 %1008 }
  0xab   : > { %v1504_v37 = vpop.permute.xlu0 %1056 }
  0xaf   : > { %v1498_v34 = vpop.permute.xlu1 %832 }
  0xb0   : > { %v1508_v39 = vpop.permute.xlu0 %916 }
  0xb4   : > { %v1502_v36 = vpop.permute.xlu1 %1040 }
  0xb5   : > { %v1512_v41 = vpop.permute.xlu0 %1088 }
  0xb9   : > { %v1506_v38 = vpop.permute.xlu1 %888 }
  0xba   : > { %v1516_v43 = vpop.permute.xlu0 %976 }
  0xbe   : > { %v1510_v40 = vpop.permute.xlu1 %1072  ;;  %v1520_v45 = vpop.permute.xlu0 %953 }
  0xc3   : > { %v1514_v42 = vpop.permute.xlu1 %944 }
  0xc8   : > { %v1518_v44 = vpop.permute.xlu1 %1097 }
  0xc9   : > { %1957 = vst [vmem:[#allocation2_spill] sm:$0xff] %v1518_v44 }
 0x16e   : > { %v619_v17 = vpop.f32.mrb[0].mxu0  ;;  %v700_v18 = vpop.f32.mrb[0].mxu1 }
 0x16f   : > { %v620_v19 = vadd.f32 %v619_v17, %v541_v14  ;;  %v1446_v20 = vadd.f32 %v700_v18, %v629_v15  ;;  %v621_v21 = vpop.f32.mrb[1].mxu0  ;;  %v702_v22 = vpop.f32.mrb[1].mxu1 }
 0x170   : > { %v622_v23 = vadd.f32 %v621_v21, %v541_v14  ;;  %v1465_v26 = vadd.f32 %v702_v22, %v629_v15 }
 0x171   : > { %v1448_v24 = vmul.f32 %v721_v16, %v620_v19  ;;  %983 = vrot.lane.b32.xlu0 %v1446_v20, %s1295_s19  ;;  %725 = vrot.lane.b32.xlu1 %v620_v19, %s1296_s21  ;;  %v965_v22 = vmul.f32 %v1480_v28, %v1446_v20 }
 0x172   : > { %v1452_v25 = vmul.f32 %v721_v16, %v622_v23 }
 0x175   : > { %1015 = vrot.lane.b32.xlu0 %v1446_v20, %s1297_s22  ;;  %967 = vrot.lane.b32.xlu1 %v1446_v20, %s1296_s21 }
 0x179   : > { %1047 = vrot.lane.b32.xlu0 %v1446_v20, %s1298_s23  ;;  %755 = vrot.lane.b32.xlu1 %v620_v19, %s1295_s19 }
 0x17d   : > { %895 = vrot.lane.b32.xlu0 %v620_v19, %s1299_s24  ;;  %783 = vrot.lane.b32.xlu1 %v620_v19, %s1300_s27 }
 0x181   : > { %1063 = vrot.lane.b32.xlu0 %v1446_v20, %s1299_s24  ;;  %999 = vrot.lane.b32.xlu1 %v1446_v20, %s1300_s27 }
 0x185   : > { %727 = vrot.lane.b32.xlu0 %v622_v23, %s1296_s21  ;;  %811 = vrot.lane.b32.xlu1 %v620_v19, %s1297_s22 }
 0x189   : > { %969 = vrot.lane.b32.xlu0 %v1465_v26, %s1296_s21  ;;  %839 = vrot.lane.b32.xlu1 %v620_v19, %s1301_s28  ;;  %s1213_s21 = sshll.u32 %s2012_s26, 2 }
 0x18d   : > { %785 = vrot.lane.b32.xlu0 %v622_v23, %s1300_s27  ;;  %1031 = vrot.lane.b32.xlu1 %v1446_v20, %s1301_s28 }
 0x191   : > { %1001 = vrot.lane.b32.xlu0 %v1465_v26, %s1300_s27  ;;  %867 = vrot.lane.b32.xlu1 %v620_v19, %s1298_s23 }
 0x195   : > { %841 = vrot.lane.b32.xlu0 %v622_v23, %s1301_s28  ;;  %923 = vrot.lane.b32.xlu1 %v620_v19, %s1302_s29 }
 0x199   : > { %1033 = vrot.lane.b32.xlu0 %v1465_v26, %s1301_s28  ;;  %757 = vrot.lane.b32.xlu1 %v622_v23, %s1295_s19 }
 0x19d   : > { %925 = vrot.lane.b32.xlu0 %v622_v23, %s1302_s29  ;;  %985 = vrot.lane.b32.xlu1 %v1465_v26, %s1295_s19  ;;  %s447_s19 = scalar_lea.vmem %s1951_s12, %s1223_s20 }
 0x1a1   : > { %1081 = vrot.lane.b32.xlu0 %v1465_v26, %s1302_s29  ;;  %813 = vrot.lane.b32.xlu1 %v622_v23, %s1297_s22 }
 0x1a5   : > { %1017 = vrot.lane.b32.xlu1 %v1465_v26, %s1297_s22 }
 0x1a9   : > { %869 = vrot.lane.b32.xlu1 %v622_v23, %s1298_s23 }
 0x1ad   : > { %1049 = vrot.lane.b32.xlu1 %v1465_v26, %s1298_s23 }
 0x1b1   : > { %897 = vrot.lane.b32.xlu1 %v622_v23, %s1299_s24 }
 0x1b5   : > { %1065 = vrot.lane.b32.xlu1 %v1465_v26, %s1299_s24  ;;  %s451_s24 = scalar_lea.vmem %s1952_s13, %s1213_s21 }
 0x1b9   : > { %1079 = vrot.lane.b32.xlu1 %v1446_v20, %s1302_s29 }
 0x1e3   : > { %v1522_v46 = vpop.permute.xlu0 %983  ;;  %v726_v47 = vpop.permute.xlu1 %725 }
 0x1e7   : > { %v1534_v50 = vpop.permute.xlu0 %1015  ;;  %v968_v51 = vpop.permute.xlu1 %967 }
 0x1eb   : > { %v1538_v52 = vpop.permute.xlu0 %1047  ;;  %v1540_v53 = vpop.permute.xlu1 %755 }
 0x1ef   : > { %v1552_v56 = vpop.permute.xlu0 %895  ;;  %v784_v57 = vpop.permute.xlu1 %783 }
 0x1f3   : > { %v1561_v0 = vpop.permute.xlu0 %1063  ;;  %v1000_v2 = vpop.permute.xlu1 %999 }
 0x1f7   : > { %v728_v3 = vpop.permute.xlu0 %727  ;;  %v1576_v4 = vpop.permute.xlu1 %811 }
 0x1f8   : > { %v732_v6 = vsel %vm731_vm7, %v726_v47, %v728_v3  ;;  %v733_v7 = vsel %vm731_vm7, %v728_v3, %v726_v47 }
 0x1f9   : > { %v745_v8 = vsel %vm1568_vm8, %v733_v7, 0.0  ;;  %v746_v9 = vsel %vm1572_vm9, %v732_v6, 0.0  ;;  %v762_v6 = vsel %vm710_vm3, 1, %v1955_v1 }
 0x1fa   : > { %v751_v10 = vmul.f32 %v749_v27, %v745_v8  ;;  %v752_v11 = vmul.f32 %v749_v27, %v746_v9  ;;  %v930_v8 = vsel %vm715_vm14, 1, %v1955_v1 }
 0x1fb   : > { %v970_v14 = vpop.permute.xlu0 %969  ;;  %v840_v15 = vpop.permute.xlu1 %839 }
 0x1fc   : > { %v1590_v16 = vadd.f32 %v751_v10, %v1448_v24  ;;  %v1593_v17 = vadd.f32 %v752_v11, %v1452_v25  ;;  %v1597_v18 = vsel %vm731_vm7, %v968_v51, %v970_v14  ;;  %v1601_v19 = vsel %vm731_vm7, %v970_v14, %v968_v51 }
 0x1fd   : > { %v846_v25 = vsel %vm709_vm5, 1, %v1955_v1  ;;  %v818_v11 = vsel %vm708_vm2, 1, %v1955_v1  ;;  %vm1983_vm2 = vmmov %vm1982_vm0  ;;  %v1984_v44 = vsel %vm1568_vm8, %v1601_v19, 0.0  ;;  %v1985_v14 = vsel %vm1572_vm9, %v1597_v18, 0.0 }
 0x1fe   : > { %v850_v3 = vrot.slane %v846_v25, %v1547_v54  ;;  %v854_v5 = vrot.slane %v846_v25, %v1550_v55  ;;  %v822_v13 = vrot.slane %v818_v11, %v1547_v54  ;;  %vm1988_vm9 = vmmov %vm1983_vm2 }
 0x1ff   : > { %v786_v27 = vpop.permute.xlu0 %785  ;;  %v1032_v47 = vpop.permute.xlu1 %1031 }
 0x200   : > { %v788_v51 = vsel %vm787_vm10, %v784_v57, %v786_v27  ;;  %v789_v58 = vsel %vm787_vm10, %v786_v27, %v784_v57  ;;  %vm1660_vm1 = vcmp.eq.s32.totalorder %v850_v3, 1  ;;  %vm1665_vm3 = vcmp.eq.s32.totalorder %v854_v5, 1 }
 0x201   : > { %v801_v61 = vsel %vm1611_vm12, %v789_v58, 0.0  ;;  %v802_v62 = vsel %vm1615_vm13, %v788_v51, 0.0  ;;  %v770_v27 = vrot.slane %v762_v6, %v1550_v55  ;;  %v934_v51 = vrot.slane %v930_v8, %v1547_v54 }
 0x202   : > { %v938_v58 = vrot.slane %v930_v8, %v1550_v55  ;;  %v826_v3 = vrot.slane %v818_v11, %v1550_v55  ;;  %v966_v5 = vmul.f32 %v1480_v28, %v1465_v26  ;;  %vm1715_vm11 = vcmp.eq.s32.totalorder %v822_v13, 1 }
 0x203   : > { %v1002_v57 = vpop.permute.xlu0 %1001  ;;  %v1639_v7 = vpop.permute.xlu1 %867  ;;  %vm1701_vm7 = vcmp.eq.s32.totalorder %v770_v27, 1 }
 0x204   : > { %v1644_v9 = vsel %vm787_vm10, %v1000_v2, %v1002_v57  ;;  %v1648_v10 = vsel %vm787_vm10, %v1002_v57, %v1000_v2  ;;  %v766_v2 = vrot.slane %v762_v6, %v1547_v54  ;;  %vm1706_vm10 = vcmp.eq.s32.totalorder %v934_v51, 1 }
 0x205   : > { %vm1710_vm14 = vcmp.eq.s32.totalorder %v938_v58, 1  ;;  %vm1719_vm5 = vcmp.eq.s32.totalorder %v826_v3, 1  ;;  %v874_v51 = vsel %vm714_vm4, 1, %v1955_v1 }
 0x206   : > { %vm1697_vm6 = vcmp.eq.s32.totalorder %v766_v2, 1  ;;  %v878_v19 = vrot.slane %v874_v51, %v1547_v54 }
 0x207   : > { %v842_v57 = vpop.permute.xlu0 %841  ;;  %v924_v12 = vpop.permute.xlu1 %923 }
 0x208   : > { %v1680_v21 = vsel %vm843_vm15, %v840_v15, %v842_v57  ;;  %v1684_v6 = vsel %vm843_vm15, %v842_v57, %v840_v15 }
 0x209   : > { %v857_v20 = vsel %vm1660_vm1, %v1680_v21, 0.0  ;;  %v858_v26 = vsel %vm1665_vm3, %v1684_v6, 0.0 }
 0x20b   : > { %v1034_v8 = vpop.permute.xlu0 %1033  ;;  %v758_v11 = vpop.permute.xlu1 %757 }
 0x20c   : > { %v1726_v58 = vsel %vm843_vm15, %v1032_v47, %v1034_v8  ;;  %v1730_v57 = vsel %vm843_vm15, %v1034_v8, %v1032_v47  ;;  %v760_v13 = vsel %vm1982_vm0, %v1540_v53, %v758_v11  ;;  %v761_v3 = vsel %vm1983_vm2, %v758_v11, %v1540_v53  ;;  %vm1989_vm15 = vmmov %vm1983_vm2 }
 0x20d   : > { %v1037_v6 = vsel %vm1660_vm1, %v1726_v58, 0.0  ;;  %v1038_v1 = vsel %vm1665_vm3, %v1730_v57, 0.0  ;;  %v773_v47 = vsel %vm1697_vm6, %v761_v3, 0.0  ;;  %v774_v8 = vsel %vm1701_vm7, %v760_v13, 0.0 }
 0x20e   : > { %v979_v53 = vmul.f32 %v1516_v43, %v1984_v44  ;;  %v980_v11 = vmul.f32 %v1516_v43, %v1985_v14  ;;  %v779_v25 = vmul.f32 %v1484_v29, %v773_v47  ;;  %v780_v58 = vmul.f32 %v1484_v29, %v774_v8 }
 0x20f   : > { %v807_v57 = vmul.f32 %v1487_v30, %v801_v61  ;;  %v808_v13 = vmul.f32 %v1487_v30, %v802_v62  ;;  %v926_v3 = vpop.permute.xlu0 %925  ;;  %v986_v63 = vpop.permute.xlu1 %985  ;;  %v882_v44 = vrot.slane %v874_v51, %v1550_v55  ;;  %vm1986_vm0 = vcmp.lt.s32.totalorder %v1556_v59, 111 }
 0x210   : > { %v781_v60 = vadd.f32 %v779_v25, %v1590_v16  ;;  %v782_v18 = vadd.f32 %v780_v58, %v1593_v17  ;;  %v1768_v43 = vsel %vm1986_vm0, %v924_v12, %v926_v3  ;;  %vm1987_vm8 = vmmov %vm1986_vm0  ;;  %v987_v16 = vsel %vm1988_vm9, %v1522_v46, %v986_v63 }
 0x211   : > { %v1772_v29 = vsel %vm1987_vm8, %v926_v3, %v924_v12  ;;  %v941_v30 = vsel %vm1706_vm10, %v1768_v43, 0.0  ;;  %v988_v17 = vsel %vm1989_vm15, %v986_v63, %v1522_v46  ;;  %v981_v62 = vadd.f32 %v979_v53, %v965_v22  ;;  %vm2007_vm9 = vmmov %vm1987_vm8 }
 0x212   : > { %v982_v51 = vadd.f32 %v980_v11, %v966_v5  ;;  %v989_v12 = vsel %vm1697_vm6, %v988_v17, 0.0  ;;  %v990_v47 = vsel %vm1701_vm7, %v987_v16, 0.0  ;;  %v810_v25 = vadd.f32 %v808_v13, %v782_v18 }
 0x213   : > { %v995_v8 = vmul.f32 %v1491_v31, %v989_v12  ;;  %v996_v14 = vmul.f32 %v1491_v31, %v990_v47  ;;  %v814_v58 = vpop.permute.xlu1 %813  ;;  %v809_v3 = vadd.f32 %v807_v57, %v781_v60  ;;  %v1990_v61 = vsel %vm1611_vm12, %v1648_v10, 0.0 }
 0x214   : > { %v1011_v46 = vmul.f32 %v1494_v32, %v1990_v61  ;;  %v1991_v22 = vsel %vm1615_vm13, %v1644_v9, 0.0  ;;  %vm1992_vm1 = vcmp.lt.s32.totalorder %v1556_v59, 1  ;;  %vm871_vm12 = vcmp.lt.s32.totalorder %v1556_v59, 113 }
 0x215   : > { %v1012_v5 = vmul.f32 %v1494_v32, %v1991_v22  ;;  %v816_v28 = vsel %vm1992_vm1, %v1576_v4, %v814_v58  ;;  %vm1993_vm3 = vmmov %vm1992_vm1  ;;  %v997_v15 = vadd.f32 %v995_v8, %v981_v62  ;;  %v998_v23 = vadd.f32 %v996_v14, %v982_v51 }
 0x216   : > { %v817_v31 = vsel %vm1993_vm3, %v814_v58, %v1576_v4  ;;  %v830_v24 = vsel %vm1719_vm5, %v816_v28, 0.0  ;;  %vm1815_vm13 = vcmp.eq.s32.totalorder %v878_v19, 1  ;;  %v863_v4 = vmul.f32 %v1500_v35, %v857_v20  ;;  %vm1996_vm4 = vmmov %vm1992_vm1 }
 0x217   : > { %v829_v10 = vsel %vm1715_vm11, %v817_v31, 0.0  ;;  %v836_v32 = vmul.f32 %v1498_v34, %v830_v24  ;;  %v864_v11 = vmul.f32 %v1500_v35, %v858_v26  ;;  %v1013_v57 = vadd.f32 %v1011_v46, %v997_v15  ;;  %v1018_v63 = vpop.permute.xlu1 %1017  ;;  %vm1997_vm6 = vmmov %vm1992_vm1 }
 0x218   : > { %v835_v9 = vmul.f32 %v1498_v34, %v829_v10  ;;  %v1014_v13 = vadd.f32 %v1012_v5, %v998_v23  ;;  %v1019_v61 = vsel %vm1996_vm4, %v1534_v50, %v1018_v63  ;;  %v1020_v34 = vsel %vm1997_vm6, %v1018_v63, %v1534_v50 }
 0x219   : > { %v838_v18 = vadd.f32 %v836_v32, %v810_v25  ;;  %v1021_v19 = vsel %vm1715_vm11, %v1020_v34, 0.0  ;;  %v1022_v20 = vsel %vm1719_vm5, %v1019_v61, 0.0  ;;  %vm1831_vm7 = vcmp.eq.s32.totalorder %v882_v44, 1 }
 0x21a   : > { %v837_v60 = vadd.f32 %v835_v9, %v809_v3  ;;  %v2000_v26 = vmov 0   ;;  %vm2001_vm2 = vcmp.le.s32.totalorder %v1532_v49, 14  ;;  %v1027_v17 = vmul.f32 %v1496_v33, %v1021_v19 }
 0x21b   : > { %v902_v16 = vsel %vm2001_vm2, 1, %v2000_v26  ;;  %v1028_v62 = vmul.f32 %v1496_v33, %v1022_v20  ;;  %v866_v51 = vadd.f32 %v864_v11, %v838_v18  ;;  %v1043_v2 = vmul.f32 %v1502_v36, %v1037_v6  ;;  %v870_v27 = vpop.permute.xlu1 %869  ;;  %v1082_v20 = vpop.permute.xlu0 %1081 }
 0x21c   : > { %v865_v50 = vadd.f32 %v863_v4, %v837_v60  ;;  %v1044_v12 = vmul.f32 %v1502_v36, %v1038_v1  ;;  %v1029_v47 = vadd.f32 %v1027_v17, %v1013_v57  ;;  %v872_v8 = vsel %vm871_vm12, %v1639_v7, %v870_v27 }
 0x21d   : > { %v1030_v44 = vadd.f32 %v1028_v62, %v1014_v13  ;;  %v873_v49 = vsel %vm871_vm12, %v870_v27, %v1639_v7  ;;  %v885_v33 = vsel %vm1815_vm13, %v872_v8, 0.0  ;;  %v906_v6 = vrot.slane %v902_v16, %v1547_v54 }
 0x21e   : > { %v886_v14 = vsel %vm1831_vm7, %v873_v49, 0.0  ;;  %v910_v1 = vrot.slane %v902_v16, %v1550_v55  ;;  %v891_v36 = vmul.f32 %v1506_v38, %v885_v33  ;;  %v1045_v58 = vadd.f32 %v1043_v2, %v1029_v47 }
 0x21f   : > { %v892_v25 = vmul.f32 %v1506_v38, %v886_v14  ;;  %v1046_v3 = vadd.f32 %v1044_v12, %v1030_v44  ;;  %v1050_v46 = vpop.permute.xlu1 %1049  ;;  %vm899_vm11 = vcmp.lt.s32.totalorder %v1556_v59, 112  ;;  %vm1869_vm5 = vcmp.eq.s32.totalorder %v906_v6, 1  ;;  %v2008_v44 = vld [vmem:[#allocation2_spill] sm:$0xff] }
 0x220   : > { %v893_v22 = vadd.f32 %v891_v36, %v865_v50  ;;  %v1051_v7 = vsel %vm871_vm12, %v1538_v52, %v1050_v46  ;;  %v1052_v28 = vsel %vm871_vm12, %v1050_v46, %v1538_v52  ;;  %vm1873_vm0 = vcmp.eq.s32.totalorder %v910_v1, 1 }
 0x221   : > { %v894_v5 = vadd.f32 %v892_v25, %v866_v51  ;;  %v1053_v54 = vsel %vm1815_vm13, %v1051_v7, 0.0  ;;  %v1054_v55 = vsel %vm1831_vm7, %v1052_v28, 0.0  ;;  %v947_v57 = vmul.f32 %v1514_v42, %v941_v30 }
 0x222   : > { %v1059_v38 = vmul.f32 %v1504_v37, %v1053_v54  ;;  %v1060_v31 = vmul.f32 %v1504_v37, %v1054_v55  ;;  %vm1116_vm15 = vcmask 3072  }
 0x223   : > { %v898_v52 = vpop.permute.xlu1 %897 }
 0x224   : > { %v1061_v10 = vadd.f32 %v1059_v38, %v1045_v58  ;;  %v1062_v24 = vadd.f32 %v1060_v31, %v1046_v3  ;;  %v900_v9 = vsel %vm899_vm11, %v1552_v56, %v898_v52  ;;  %v901_v32 = vsel %vm899_vm11, %v898_v52, %v1552_v56 }
 0x225   : > { %v913_v37 = vsel %vm1869_vm5, %v900_v9, 0.0  ;;  %v914_v53 = vsel %vm1873_vm0, %v901_v32, 0.0  ;;  %v2006_v56 = vsel %vm1710_vm14, %v1772_v29, 0.0 }
 0x226   : > { %v919_v4 = vmul.f32 %v1508_v39, %v913_v37  ;;  %v920_v11 = vmul.f32 %v1508_v39, %v914_v53  ;;  %v948_v13 = vmul.f32 %v1514_v42, %v2006_v56 }
 0x227   : > { %v1066_v63 = vpop.permute.xlu1 %1065 }
 0x228   : > { %v921_v60 = vadd.f32 %v919_v4, %v893_v22  ;;  %v922_v18 = vadd.f32 %v920_v11, %v894_v5  ;;  %v1067_v61 = vsel %vm899_vm11, %v1561_v0, %v1066_v63  ;;  %v1068_v39 = vsel %vm899_vm11, %v1066_v63, %v1561_v0 }
 0x229   : > { %v1069_v43 = vsel %vm1869_vm5, %v1067_v61, 0.0  ;;  %v1070_v30 = vsel %vm1873_vm0, %v1068_v39, 0.0 }
 0x22a   : > { %v949_v29 = vadd.f32 %v947_v57, %v921_v60  ;;  %v950_v34 = vadd.f32 %v948_v13, %v922_v18  ;;  %v1075_v42 = vmul.f32 %v1510_v40, %v1069_v43  ;;  %v1076_v19 = vmul.f32 %v1510_v40, %v1070_v30 }
 0x22b   : > { %v1080_v35 = vpop.permute.xlu1 %1079 }
 0x22c   : > { %v1077_v26 = vadd.f32 %v1075_v42, %v1061_v10  ;;  %v1078_v16 = vadd.f32 %v1076_v19, %v1062_v24  ;;  %v1083_v0 = vsel %vm1987_vm8, %v1080_v35, %v1082_v20  ;;  %v1084_v17 = vsel %vm2007_vm9, %v1082_v20, %v1080_v35 }
 0x22d   : > { %v1085_v62 = vsel %vm1706_vm10, %v1083_v0, 0.0  ;;  %v1086_v51 = vsel %vm1710_vm14, %v1084_v17, 0.0  ;;  %v956_v27 = vadd.f32 %v1520_v45, %v949_v29  ;;  %v957_v47 = vadd.f32 %v1520_v45, %v950_v34 }
 0x22e   : > { %v1091_v50 = vmul.f32 %v1512_v41, %v1085_v62  ;;  %v1092_v40 = vmul.f32 %v1512_v41, %v1086_v51  ;;  %vm2009_vm10 = vcmask 1043456  }
 0x22f   : > { %vm2010_vm14 = vmmov %vm2009_vm10 }
 0x230   : > { %v1093_v2 = vadd.f32 %v1091_v50, %v1077_v26  ;;  %v1094_v12 = vadd.f32 %v1092_v40, %v1078_v16 }
 0x232   : > { %v1100_v59 = vadd.f32 %v2008_v44, %v1093_v2  ;;  %v1101_v8 = vadd.f32 %v2008_v44, %v1094_v12 }
 0x234   : > { %v1102_v48 = vmul.f32 %v1100_v59, %v956_v27  ;;  %v1103_v49 = vmul.f32 %v1101_v8, %v957_v47 }
 0x236   : > { %v1109_v41 = vsel %vm2009_vm10, %v1102_v48, 0.0  ;;  %v1110_v21 = vsel %vm2010_vm14, %v1103_v49, 0.0  ;;  %v1106_v33 = vcombine.low %v1102_v48, %v1103_v49 }
 0x237   : > { %v1111_v14 = vadd.f32 %v1110_v21, %v1109_v41 }
 0x238   : > { %1108 = vst [vmem:[%s447_s19] sm:$0xff] %v1106_v33 }
 0x239   : > { %1112 = vadd.xlane.f32.xlu1 %v1111_v14 }
 0x2c6   : > { %v1113_v45 = vpop.xlane.xlu1 %1112 }
 0x2c7   : > { %v1115_v6 = vmul.f32 0.00390625, %v1113_v45 }
 0x2c9   : > { %1117 = vst.msk [vmem:[%s451_s24] sm:$0xf] %vm1116_vm15, %v1115_v6 }
 0x2ca PF: > { %s24_s25 = sadd.s32 1, %s1282_s25  }
 0x2cb   : > { %p21_p4 = scmp.ge.s32.totalorder %s24_s25, 4  }
 0x2cd   :  { %23 = sbr.rel (!%p21_p4) target bundleno = 1 (0x1), region = 111 }

</bundles_post_ra>
